<compile_context>
chip_gen: v6e
topology: v6e:2x2x1
jax: 0.10.0
libtpu: 0.0.40
codegen_flags: <defaults>
</compile_context>

<pallas_src>
import functools

import jax
import jax.numpy as jnp
import numpy as np
from jax.experimental import pallas as pl
from jax.experimental.pallas import tpu as pltpu


def _rcab_kernel(x_ref, w1_ref, bb1_ref, w2_ref, bb2_ref,
                 wd1_ref, bd1_ref, wd2_ref, bd2_ref,
                 fold_ref, bcast_ref,
                 o_ref, pad_ref,
                 *, H, W, C, K):
    B = x_ref.shape[0]
    P = K // 2
    WC = W * C
    PWC = (W + 2 * P) * C          # padded lane width
    M = B * H                      # matmul row count

    # --- zero only the halo border strips of the padded scratch -------------
    # (interior is fully overwritten by every conv).  Done per step so it
    # stays correct if the parallel axis is ever sharded across TensorCores.
    zrow = jnp.zeros((B, P, PWC), pad_ref.dtype)
    pad_ref[:, 0:P, :] = zrow
    pad_ref[:, P + H:H + 2 * P, :] = zrow
    zcol = jnp.zeros((B, H + 2 * P, P * C), pad_ref.dtype)
    pad_ref[:, :, 0:P * C] = zcol
    pad_ref[:, :, (P + W) * C:PWC] = zcol

    def conv(inp_bhw_bf16, wtaps_ref, bias_ref):
        # inp: (B, H, W*C) bf16 -> f32 conv output (M, W*C) with bias added.
        pad_ref[:, P:P + H, P * C:(P + W) * C] = inp_bhw_bf16
        # Per-tap accumulation on the MXU: no im2col patch materialization.
        acc = jnp.zeros((M, WC), jnp.float32)
        for kh in range(K):
            for kw in range(K):
                t = kh * K + kw
                tap = pad_ref[:, kh:kh + H, kw * C:kw * C + WC].reshape(M, WC)
                acc = acc + jnp.dot(tap, wtaps_ref[t],
                                    preferred_element_type=jnp.float32)
        return acc + bias_ref[...]                                  # (1, WC) bias

    x_f32 = x_ref[...].astype(jnp.float32)                          # (B, H, WC)

    # body: conv -> ReLU -> conv  (bf16 matmul operands, f32 everywhere else)
    h1 = jnp.maximum(conv(x_f32.astype(jnp.bfloat16), w1_ref, bb1_ref), 0.0)
    res = conv(h1.reshape(B, H, WC).astype(jnp.bfloat16), w2_ref, bb2_ref)

    # --- CALayer: GAP -> 1x1 -> ReLU -> 1x1 -> sigmoid -> channel scale -----
    res3 = res.reshape(B, H, WC)
    row_sum = jnp.sum(res3, axis=1)                                 # (B, WC)
    # Fold W out of the lanes with a tiny constant matmul (tiled identity).
    ch_sum = jnp.dot(row_sum, fold_ref[...],
                     preferred_element_type=jnp.float32)            # (B, C)
    y = ch_sum * (1.0 / (H * W))                                    # (B, C)
    z = jnp.maximum(
        jnp.dot(y, wd1_ref[...], preferred_element_type=jnp.float32)
        + bd1_ref[...], 0.0)                                        # (B, C//red)
    s = jax.nn.sigmoid(
        jnp.dot(z, wd2_ref[...], preferred_element_type=jnp.float32)
        + bd2_ref[...])                                             # (B, C)
    # Broadcast channel scales back across the W lanes via constant matmul.
    s_big = jnp.dot(s, bcast_ref[...],
                    preferred_element_type=jnp.float32)             # (B, W*C)

    # channel-wise rescale + residual add; lane-dense store (last dim = W*C).
    o_ref[...] = (res3 * s_big[:, None, :] + x_f32).astype(o_ref.dtype)


def _expand_conv_weight_per_tap(w_hwio, W, dtype=jnp.bfloat16):
    # (K,K,Cin,Cout) HWIO -> per-tap block-diagonal weights (K*K, W*Cin, W*Cout):
    #   big[kh*K+kw, wi*Cin+ci, wo*Cout+co] = w[kh,kw,ci,co] * (wi == wo)
    K, _, Cin, Cout = w_hwio.shape
    eye = jnp.eye(W, dtype=w_hwio.dtype)
    big = jnp.einsum('uvio,wx->uvwixo', w_hwio, eye)
    return big.reshape(K * K, W * Cin, W * Cout).astype(dtype)


def _pick_batch_block(N, H, max_rows=512, min_rows_per_step=256):
    # Largest divisor of N with B_blk*H <= max_rows.  Only keep >=2 grid steps
    # (v7x megacore sharding) when each step still has >= min_rows_per_step
    # rows of matmul work; otherwise one bigger step beats the split.
    divs = [d for d in range(1, N + 1) if N % d == 0 and d * H <= max_rows]
    if not divs:
        return 1
    multi = [d for d in divs if N // d >= 2 and d * H >= min_rows_per_step]
    return max(multi) if multi else max(divs)


@jax.jit
def rcab_pallas(x, w1, b1, w2, b2, wd1, bd1, wd2, bd2):
    N, H, W, C = x.shape
    K = w1.shape[0]
    P = K // 2
    WC = W * C
    B_blk = _pick_batch_block(N, H)

    x2 = x.reshape(N, H, WC)                      # fold W,C onto lanes (free)

    wb1 = _expand_conv_weight_per_tap(w1, W)      # (K*K, WC, WC) bf16
    wb2 = _expand_conv_weight_per_tap(w2, W)
    bb1 = jnp.tile(b1, W).reshape(1, WC).astype(jnp.float32)
    bb2 = jnp.tile(b2, W).reshape(1, WC).astype(jnp.float32)
    wd1_f = wd1.astype(jnp.float32)
    wd2_f = wd2.astype(jnp.float32)
    bd1_2 = bd1.reshape(1, -1).astype(jnp.float32)
    bd2_2 = bd2.reshape(1, -1).astype(jnp.float32)
    # 0/1 constants for the CALayer lane fold / channel broadcast matmuls.
    fold = jnp.tile(jnp.eye(C, dtype=jnp.float32), (W, 1))    # (W*C, C)
    bcast = jnp.tile(jnp.eye(C, dtype=jnp.float32), (1, W))   # (C, W*C)

    def full(a):
        nd = a.ndim
        return pl.BlockSpec(a.shape, lambda b, _nd=nd: (0,) * _nd)

    kernel = functools.partial(_rcab_kernel, H=H, W=W, C=C, K=K)

    out = pl.pallas_call(
        kernel,
        out_shape=jax.ShapeDtypeStruct((N, H, WC), x.dtype),
        grid_spec=pltpu.PrefetchScalarGridSpec(
            num_scalar_prefetch=0,
            grid=(N // B_blk,),
            in_specs=[
                pl.BlockSpec((B_blk, H, WC), lambda b: (b, 0, 0)),
                full(wb1), full(bb1), full(wb2), full(bb2),
                full(wd1_f), full(bd1_2), full(wd2_f), full(bd2_2),
                full(fold), full(bcast),
            ],
            out_specs=pl.BlockSpec((B_blk, H, WC), lambda b: (b, 0, 0)),
            scratch_shapes=[
                # padded activation scratch (only scratch left: im2col dropped)
                pltpu.VMEM((B_blk, H + 2 * P, (W + 2 * P) * C), jnp.bfloat16),
            ],
        ),
        compiler_params=pltpu.CompilerParams(
            dimension_semantics=("parallel",)),
    )(x2, wb1, bb1, wb2, bb2, wd1_f, bd1_2, wd2_f, bd2_2, fold, bcast)

    return out.reshape(N, H, W, C)


def rcab_reference(x, w1, b1, w2, b2, wd1, bd1, wd2, bd2):
    # plain-JAX f32 reference (NHWC, HWIO) mirroring the PyTorch forward.
    def conv(inp, w, b):
        out = jax.lax.conv_general_dilated(
            inp, w, window_strides=(1, 1), padding="SAME",
            dimension_numbers=("NHWC", "HWIO", "NHWC"))
        return out + b.reshape(1, 1, 1, -1)

    h = jax.nn.relu(conv(x, w1, b1))
    res = conv(h, w2, b2)
    y = jnp.mean(res, axis=(1, 2), keepdims=True)                    # (N,1,1,C)
    y = jax.nn.relu(jnp.einsum("nijc,cd->nijd", y, wd1) + bd1.reshape(1, 1, 1, -1))
    y = jax.nn.sigmoid(jnp.einsum("nijd,dc->nijc", y, wd2) + bd2.reshape(1, 1, 1, -1))
    return res * y + x


if __name__ == "__main__":
    # RCAB(conv, n_feat=16, kernel_size=3, reduction=4); W*C = 128 (lane-dense)
    N, H, W, C = 2, 8, 8, 16
    K, RED = 3, 4
    Cr = C // RED

    key = jax.random.PRNGKey(0)
    ks = jax.random.split(key, 9)
    x   = jax.random.normal(ks[0], (N, H, W, C), jnp.float32)
    w1  = jax.random.normal(ks[1], (K, K, C, C), jnp.float32) * 0.1
    b1  = jax.random.normal(ks[2], (C,), jnp.float32) * 0.1
    w2  = jax.random.normal(ks[3], (K, K, C, C), jnp.float32) * 0.1
    b2  = jax.random.normal(ks[4], (C,), jnp.float32) * 0.1
    wd1 = jax.random.normal(ks[5], (C, Cr), jnp.float32) * 0.1
    bd1 = jax.random.normal(ks[6], (Cr,), jnp.float32) * 0.1
    wd2 = jax.random.normal(ks[7], (Cr, C), jnp.float32) * 0.1
    bd2 = jax.random.normal(ks[8], (C,), jnp.float32) * 0.1

    out = rcab_pallas(x, w1, b1, w2, b2, wd1, bd1, wd2, bd2)
    out = jax.block_until_ready(out)

    ref = rcab_reference(x, w1, b1, w2, b2, wd1, bd1, wd2, bd2)
    # bf16 MXU operands (f32 accumulation) vs. pure-f32 reference -> looser tol.
    np.testing.assert_allclose(np.asarray(out), np.asarray(ref),
                               rtol=5e-2, atol=5e-2)
    print("KERNEL_OK")
</pallas_src>

<mosaic_0001>
module attributes {stable_mosaic.version = 11 : i64} {
  func.func @_rcab_kernel(%arg0: i32, %arg1: memref<2x8x128xf32, #tpu.memory_space<vmem>>, %arg2: memref<9x128x128xbf16, #tpu.memory_space<vmem>>, %arg3: memref<1x128xf32, #tpu.memory_space<vmem>>, %arg4: memref<9x128x128xbf16, #tpu.memory_space<vmem>>, %arg5: memref<1x128xf32, #tpu.memory_space<vmem>>, %arg6: memref<16x4xf32, #tpu.memory_space<vmem>>, %arg7: memref<1x4xf32, #tpu.memory_space<vmem>>, %arg8: memref<4x16xf32, #tpu.memory_space<vmem>>, %arg9: memref<1x16xf32, #tpu.memory_space<vmem>>, %arg10: memref<128x16xf32, #tpu.memory_space<vmem>>, %arg11: memref<16x128xf32, #tpu.memory_space<vmem>>, %arg12: memref<2x8x128xf32, #tpu.memory_space<vmem>>, %arg13: memref<2x10x160xbf16, #tpu.memory_space<vmem>>) attributes {dimension_semantics = [#tpu.dimension_semantics<parallel>], iteration_bounds = array<i64: 1>, scalar_prefetch = 0 : i64, scratch_operands = 1 : i64, tpu.core_type = #tpu.core_type<tc>, window_params = [{transform_indices = @transform_0, window_bounds = array<i64: 2, 8, 128>}, {pipeline_mode = #tpu.pipeline_mode<synchronous>, transform_indices = @transform_1, window_bounds = array<i64: 9, 128, 128>}, {pipeline_mode = #tpu.pipeline_mode<synchronous>, transform_indices = @transform_2, window_bounds = array<i64: 1, 128>}, {pipeline_mode = #tpu.pipeline_mode<synchronous>, transform_indices = @transform_3, window_bounds = array<i64: 9, 128, 128>}, {pipeline_mode = #tpu.pipeline_mode<synchronous>, transform_indices = @transform_4, window_bounds = array<i64: 1, 128>}, {pipeline_mode = #tpu.pipeline_mode<synchronous>, transform_indices = @transform_5, window_bounds = array<i64: 16, 4>}, {pipeline_mode = #tpu.pipeline_mode<synchronous>, transform_indices = @transform_6, window_bounds = array<i64: 1, 4>}, {pipeline_mode = #tpu.pipeline_mode<synchronous>, transform_indices = @transform_7, window_bounds = array<i64: 4, 16>}, {pipeline_mode = #tpu.pipeline_mode<synchronous>, transform_indices = @transform_8, window_bounds = array<i64: 1, 16>}, {pipeline_mode = #tpu.pipeline_mode<synchronous>, transform_indices = @transform_9, window_bounds = array<i64: 128, 16>}, {pipeline_mode = #tpu.pipeline_mode<synchronous>, transform_indices = @transform_10, window_bounds = array<i64: 16, 128>}, {transform_indices = @transform_11, window_bounds = array<i64: 2, 8, 128>}]} {
    %cst = arith.constant 0.000000e+00 : bf16
    %0 = vector.broadcast %cst : bf16 to vector<2x1x160xbf16>
    %c0 = arith.constant 0 : index
    %c0_0 = arith.constant 0 : index
    %c0_1 = arith.constant 0 : index
    %1 = vector.load %arg13[%c0, %c0_0, %c0_1] : memref<2x10x160xbf16, #tpu.memory_space<vmem>>, vector<2x1x160xbf16>
    tpu.vector_store %arg13[%c0, %c0_0, %c0_1], %0 {strides = array<i32>} : memref<2x10x160xbf16, #tpu.memory_space<vmem>>, vector<2x1x160xbf16>,
    %c0_2 = arith.constant 0 : index
    %c9 = arith.constant 9 : index
    %c0_3 = arith.constant 0 : index
    %2 = vector.load %arg13[%c0_2, %c9, %c0_3] : memref<2x10x160xbf16, #tpu.memory_space<vmem>>, vector<2x1x160xbf16>
    tpu.vector_store %arg13[%c0_2, %c9, %c0_3], %0 {strides = array<i32>} : memref<2x10x160xbf16, #tpu.memory_space<vmem>>, vector<2x1x160xbf16>,
    %cst_4 = arith.constant 0.000000e+00 : bf16
    %3 = vector.broadcast %cst_4 : bf16 to vector<2x10x16xbf16>
    %c0_5 = arith.constant 0 : index
    %c0_6 = arith.constant 0 : index
    %c0_7 = arith.constant 0 : index
    %4 = vector.load %arg13[%c0_5, %c0_6, %c0_7] : memref<2x10x160xbf16, #tpu.memory_space<vmem>>, vector<2x10x16xbf16>
    tpu.vector_store %arg13[%c0_5, %c0_6, %c0_7], %3 {strides = array<i32>} : memref<2x10x160xbf16, #tpu.memory_space<vmem>>, vector<2x10x16xbf16>,
    %c0_8 = arith.constant 0 : index
    %c0_9 = arith.constant 0 : index
    %c144 = arith.constant 144 : index
    %5 = vector.load %arg13[%c0_8, %c0_9, %c144] : memref<2x10x160xbf16, #tpu.memory_space<vmem>>, vector<2x10x16xbf16>
    tpu.vector_store %arg13[%c0_8, %c0_9, %c144], %3 {strides = array<i32>} : memref<2x10x160xbf16, #tpu.memory_space<vmem>>, vector<2x10x16xbf16>,
    %c0_10 = arith.constant 0 : index
    %c0_11 = arith.constant 0 : index
    %c0_12 = arith.constant 0 : index
    %6 = vector.load %arg1[%c0_10, %c0_11, %c0_12] : memref<2x8x128xf32, #tpu.memory_space<vmem>>, vector<2x8x128xf32>
    %7 = arith.truncf %6 : vector<2x8x128xf32> to vector<2x8x128xbf16>
    %c0_13 = arith.constant 0 : index
    %c1 = arith.constant 1 : index
    %c16 = arith.constant 16 : index
    %8 = vector.load %arg13[%c0_13, %c1, %c16] : memref<2x10x160xbf16, #tpu.memory_space<vmem>>, vector<2x8x128xbf16>
    tpu.vector_store %arg13[%c0_13, %c1, %c16], %7 {strides = array<i32>} : memref<2x10x160xbf16, #tpu.memory_space<vmem>>, vector<2x8x128xbf16>,
    %cst_14 = arith.constant 0.000000e+00 : f32
    %9 = vector.broadcast %cst_14 : f32 to vector<16x128xf32>
    %c0_15 = arith.constant 0 : index
    %c0_16 = arith.constant 0 : index
    %c0_17 = arith.constant 0 : index
    %10 = vector.load %arg13[%c0_15, %c0_16, %c0_17] : memref<2x10x160xbf16, #tpu.memory_space<vmem>>, vector<2x8x128xbf16>
    %11 = vector.shape_cast %10 : vector<2x8x128xbf16> to vector<16x128xbf16>
    %c0_18 = arith.constant 0 : index
    %c0_19 = arith.constant 0 : index
    %c0_20 = arith.constant 0 : index
    %12 = vector.load %arg2[%c0_18, %c0_19, %c0_20] : memref<9x128x128xbf16, #tpu.memory_space<vmem>>, vector<1x128x128xbf16>
    %13 = vector.shape_cast %12 : vector<1x128x128xbf16> to vector<128x128xbf16>
    %cst_21 = arith.constant dense<0.000000e+00> : vector<16x128xf32>
    %14 = tpu.matmul %11, %13, %cst_21 {dimension_numbers = #tpu.dot_dimension_numbers<[1], [0], [0], [1], [0, 0, 1, 1], [], []>} : vector<16x128xbf16>, vector<128x128xbf16>, vector<16x128xf32> -> vector<16x128xf32>
    %15 = arith.addf %9, %14 : vector<16x128xf32>
    %c0_22 = arith.constant 0 : index
    %c0_23 = arith.constant 0 : index
    %c16_24 = arith.constant 16 : index
    %16 = vector.load %arg13[%c0_22, %c0_23, %c16_24] : memref<2x10x160xbf16, #tpu.memory_space<vmem>>, vector<2x8x128xbf16>
    %17 = vector.shape_cast %16 : vector<2x8x128xbf16> to vector<16x128xbf16>
    %c1_25 = arith.constant 1 : index
    %c0_26 = arith.constant 0 : index
    %c0_27 = arith.constant 0 : index
    %18 = vector.load %arg2[%c1_25, %c0_26, %c0_27] : memref<9x128x128xbf16, #tpu.memory_space<vmem>>, vector<1x128x128xbf16>
    %19 = vector.shape_cast %18 : vector<1x128x128xbf16> to vector<128x128xbf16>
    %cst_28 = arith.constant dense<0.000000e+00> : vector<16x128xf32>
    %20 = tpu.matmul %17, %19, %cst_28 {dimension_numbers = #tpu.dot_dimension_numbers<[1], [0], [0], [1], [0, 0, 1, 1], [], []>} : vector<16x128xbf16>, vector<128x128xbf16>, vector<16x128xf32> -> vector<16x128xf32>
    %21 = arith.addf %15, %20 : vector<16x128xf32>
    %c0_29 = arith.constant 0 : index
    %c0_30 = arith.constant 0 : index
    %c32 = arith.constant 32 : index
    %22 = vector.load %arg13[%c0_29, %c0_30, %c32] : memref<2x10x160xbf16, #tpu.memory_space<vmem>>, vector<2x8x128xbf16>
    %23 = vector.shape_cast %22 : vector<2x8x128xbf16> to vector<16x128xbf16>
    %c2 = arith.constant 2 : index
    %c0_31 = arith.constant 0 : index
    %c0_32 = arith.constant 0 : index
    %24 = vector.load %arg2[%c2, %c0_31, %c0_32] : memref<9x128x128xbf16, #tpu.memory_space<vmem>>, vector<1x128x128xbf16>
    %25 = vector.shape_cast %24 : vector<1x128x128xbf16> to vector<128x128xbf16>
    %cst_33 = arith.constant dense<0.000000e+00> : vector<16x128xf32>
    %26 = tpu.matmul %23, %25, %cst_33 {dimension_numbers = #tpu.dot_dimension_numbers<[1], [0], [0], [1], [0, 0, 1, 1], [], []>} : vector<16x128xbf16>, vector<128x128xbf16>, vector<16x128xf32> -> vector<16x128xf32>
    %27 = arith.addf %21, %26 : vector<16x128xf32>
    %c0_34 = arith.constant 0 : index
    %c1_35 = arith.constant 1 : index
    %c0_36 = arith.constant 0 : index
    %28 = vector.load %arg13[%c0_34, %c1_35, %c0_36] : memref<2x10x160xbf16, #tpu.memory_space<vmem>>, vector<2x8x128xbf16>
    %29 = vector.shape_cast %28 : vector<2x8x128xbf16> to vector<16x128xbf16>
    %c3 = arith.constant 3 : index
    %c0_37 = arith.constant 0 : index
    %c0_38 = arith.constant 0 : index
    %30 = vector.load %arg2[%c3, %c0_37, %c0_38] : memref<9x128x128xbf16, #tpu.memory_space<vmem>>, vector<1x128x128xbf16>
    %31 = vector.shape_cast %30 : vector<1x128x128xbf16> to vector<128x128xbf16>
    %cst_39 = arith.constant dense<0.000000e+00> : vector<16x128xf32>
    %32 = tpu.matmul %29, %31, %cst_39 {dimension_numbers = #tpu.dot_dimension_numbers<[1], [0], [0], [1], [0, 0, 1, 1], [], []>} : vector<16x128xbf16>, vector<128x128xbf16>, vector<16x128xf32> -> vector<16x128xf32>
    %33 = arith.addf %27, %32 : vector<16x128xf32>
    %c0_40 = arith.constant 0 : index
    %c1_41 = arith.constant 1 : index
    %c16_42 = arith.constant 16 : index
    %34 = vector.load %arg13[%c0_40, %c1_41, %c16_42] : memref<2x10x160xbf16, #tpu.memory_space<vmem>>, vector<2x8x128xbf16>
    %35 = vector.shape_cast %34 : vector<2x8x128xbf16> to vector<16x128xbf16>
    %c4 = arith.constant 4 : index
    %c0_43 = arith.constant 0 : index
    %c0_44 = arith.constant 0 : index
    %36 = vector.load %arg2[%c4, %c0_43, %c0_44] : memref<9x128x128xbf16, #tpu.memory_space<vmem>>, vector<1x128x128xbf16>
    %37 = vector.shape_cast %36 : vector<1x128x128xbf16> to vector<128x128xbf16>
    %cst_45 = arith.constant dense<0.000000e+00> : vector<16x128xf32>
    %38 = tpu.matmul %35, %37, %cst_45 {dimension_numbers = #tpu.dot_dimension_numbers<[1], [0], [0], [1], [0, 0, 1, 1], [], []>} : vector<16x128xbf16>, vector<128x128xbf16>, vector<16x128xf32> -> vector<16x128xf32>
    %39 = arith.addf %33, %38 : vector<16x128xf32>
    %c0_46 = arith.constant 0 : index
    %c1_47 = arith.constant 1 : index
    %c32_48 = arith.constant 32 : index
    %40 = vector.load %arg13[%c0_46, %c1_47, %c32_48] : memref<2x10x160xbf16, #tpu.memory_space<vmem>>, vector<2x8x128xbf16>
    %41 = vector.shape_cast %40 : vector<2x8x128xbf16> to vector<16x128xbf16>
    %c5 = arith.constant 5 : index
    %c0_49 = arith.constant 0 : index
    %c0_50 = arith.constant 0 : index
    %42 = vector.load %arg2[%c5, %c0_49, %c0_50] : memref<9x128x128xbf16, #tpu.memory_space<vmem>>, vector<1x128x128xbf16>
    %43 = vector.shape_cast %42 : vector<1x128x128xbf16> to vector<128x128xbf16>
    %cst_51 = arith.constant dense<0.000000e+00> : vector<16x128xf32>
    %44 = tpu.matmul %41, %43, %cst_51 {dimension_numbers = #tpu.dot_dimension_numbers<[1], [0], [0], [1], [0, 0, 1, 1], [], []>} : vector<16x128xbf16>, vector<128x128xbf16>, vector<16x128xf32> -> vector<16x128xf32>
    %45 = arith.addf %39, %44 : vector<16x128xf32>
    %c0_52 = arith.constant 0 : index
    %c2_53 = arith.constant 2 : index
    %c0_54 = arith.constant 0 : index
    %46 = vector.load %arg13[%c0_52, %c2_53, %c0_54] : memref<2x10x160xbf16, #tpu.memory_space<vmem>>, vector<2x8x128xbf16>
    %47 = vector.shape_cast %46 : vector<2x8x128xbf16> to vector<16x128xbf16>
    %c6 = arith.constant 6 : index
    %c0_55 = arith.constant 0 : index
    %c0_56 = arith.constant 0 : index
    %48 = vector.load %arg2[%c6, %c0_55, %c0_56] : memref<9x128x128xbf16, #tpu.memory_space<vmem>>, vector<1x128x128xbf16>
    %49 = vector.shape_cast %48 : vector<1x128x128xbf16> to vector<128x128xbf16>
    %cst_57 = arith.constant dense<0.000000e+00> : vector<16x128xf32>
    %50 = tpu.matmul %47, %49, %cst_57 {dimension_numbers = #tpu.dot_dimension_numbers<[1], [0], [0], [1], [0, 0, 1, 1], [], []>} : vector<16x128xbf16>, vector<128x128xbf16>, vector<16x128xf32> -> vector<16x128xf32>
    %51 = arith.addf %45, %50 : vector<16x128xf32>
    %c0_58 = arith.constant 0 : index
    %c2_59 = arith.constant 2 : index
    %c16_60 = arith.constant 16 : index
    %52 = vector.load %arg13[%c0_58, %c2_59, %c16_60] : memref<2x10x160xbf16, #tpu.memory_space<vmem>>, vector<2x8x128xbf16>
    %53 = vector.shape_cast %52 : vector<2x8x128xbf16> to vector<16x128xbf16>
    %c7 = arith.constant 7 : index
    %c0_61 = arith.constant 0 : index
    %c0_62 = arith.constant 0 : index
    %54 = vector.load %arg2[%c7, %c0_61, %c0_62] : memref<9x128x128xbf16, #tpu.memory_space<vmem>>, vector<1x128x128xbf16>
    %55 = vector.shape_cast %54 : vector<1x128x128xbf16> to vector<128x128xbf16>
    %cst_63 = arith.constant dense<0.000000e+00> : vector<16x128xf32>
    %56 = tpu.matmul %53, %55, %cst_63 {dimension_numbers = #tpu.dot_dimension_numbers<[1], [0], [0], [1], [0, 0, 1, 1], [], []>} : vector<16x128xbf16>, vector<128x128xbf16>, vector<16x128xf32> -> vector<16x128xf32>
    %57 = arith.addf %51, %56 : vector<16x128xf32>
    %c0_64 = arith.constant 0 : index
    %c2_65 = arith.constant 2 : index
    %c32_66 = arith.constant 32 : index
    %58 = vector.load %arg13[%c0_64, %c2_65, %c32_66] : memref<2x10x160xbf16, #tpu.memory_space<vmem>>, vector<2x8x128xbf16>
    %59 = vector.shape_cast %58 : vector<2x8x128xbf16> to vector<16x128xbf16>
    %c8 = arith.constant 8 : index
    %c0_67 = arith.constant 0 : index
    %c0_68 = arith.constant 0 : index
    %60 = vector.load %arg2[%c8, %c0_67, %c0_68] : memref<9x128x128xbf16, #tpu.memory_space<vmem>>, vector<1x128x128xbf16>
    %61 = vector.shape_cast %60 : vector<1x128x128xbf16> to vector<128x128xbf16>
    %cst_69 = arith.constant dense<0.000000e+00> : vector<16x128xf32>
    %62 = tpu.matmul %59, %61, %cst_69 {dimension_numbers = #tpu.dot_dimension_numbers<[1], [0], [0], [1], [0, 0, 1, 1], [], []>} : vector<16x128xbf16>, vector<128x128xbf16>, vector<16x128xf32> -> vector<16x128xf32>
    %63 = arith.addf %57, %62 : vector<16x128xf32>
    %c0_70 = arith.constant 0 : index
    %c0_71 = arith.constant 0 : index
    %64 = vector.load %arg3[%c0_70, %c0_71] : memref<1x128xf32, #tpu.memory_space<vmem>>, vector<1x128xf32>
    %65 = vector.broadcast %64 : vector<1x128xf32> to vector<16x128xf32>
    %66 = arith.addf %63, %65 : vector<16x128xf32>
    %cst_72 = arith.constant 0.000000e+00 : f32
    %67 = vector.broadcast %cst_72 : f32 to vector<16x128xf32>
    %68 = arith.maximumf %66, %67 : vector<16x128xf32>
    %69 = vector.shape_cast %68 : vector<16x128xf32> to vector<2x8x128xf32>
    %70 = arith.truncf %69 : vector<2x8x128xf32> to vector<2x8x128xbf16>
    %c0_73 = arith.constant 0 : index
    %c1_74 = arith.constant 1 : index
    %c16_75 = arith.constant 16 : index
    %71 = vector.load %arg13[%c0_73, %c1_74, %c16_75] : memref<2x10x160xbf16, #tpu.memory_space<vmem>>, vector<2x8x128xbf16>
    tpu.vector_store %arg13[%c0_73, %c1_74, %c16_75], %70 {strides = array<i32>} : memref<2x10x160xbf16, #tpu.memory_space<vmem>>, vector<2x8x128xbf16>,
    %cst_76 = arith.constant 0.000000e+00 : f32
    %72 = vector.broadcast %cst_76 : f32 to vector<16x128xf32>
    %c0_77 = arith.constant 0 : index
    %c0_78 = arith.constant 0 : index
    %c0_79 = arith.constant 0 : index
    %73 = vector.load %arg13[%c0_77, %c0_78, %c0_79] : memref<2x10x160xbf16, #tpu.memory_space<vmem>>, vector<2x8x128xbf16>
    %74 = vector.shape_cast %73 : vector<2x8x128xbf16> to vector<16x128xbf16>
    %c0_80 = arith.constant 0 : index
    %c0_81 = arith.constant 0 : index
    %c0_82 = arith.constant 0 : index
    %75 = vector.load %arg4[%c0_80, %c0_81, %c0_82] : memref<9x128x128xbf16, #tpu.memory_space<vmem>>, vector<1x128x128xbf16>
    %76 = vector.shape_cast %75 : vector<1x128x128xbf16> to vector<128x128xbf16>
    %cst_83 = arith.constant dense<0.000000e+00> : vector<16x128xf32>
    %77 = tpu.matmul %74, %76, %cst_83 {dimension_numbers = #tpu.dot_dimension_numbers<[1], [0], [0], [1], [0, 0, 1, 1], [], []>} : vector<16x128xbf16>, vector<128x128xbf16>, vector<16x128xf32> -> vector<16x128xf32>
    %78 = arith.addf %72, %77 : vector<16x128xf32>
    %c0_84 = arith.constant 0 : index
    %c0_85 = arith.constant 0 : index
    %c16_86 = arith.constant 16 : index
    %79 = vector.load %arg13[%c0_84, %c0_85, %c16_86] : memref<2x10x160xbf16, #tpu.memory_space<vmem>>, vector<2x8x128xbf16>
    %80 = vector.shape_cast %79 : vector<2x8x128xbf16> to vector<16x128xbf16>
    %c1_87 = arith.constant 1 : index
    %c0_88 = arith.constant 0 : index
    %c0_89 = arith.constant 0 : index
    %81 = vector.load %arg4[%c1_87, %c0_88, %c0_89] : memref<9x128x128xbf16, #tpu.memory_space<vmem>>, vector<1x128x128xbf16>
    %82 = vector.shape_cast %81 : vector<1x128x128xbf16> to vector<128x128xbf16>
    %cst_90 = arith.constant dense<0.000000e+00> : vector<16x128xf32>
    %83 = tpu.matmul %80, %82, %cst_90 {dimension_numbers = #tpu.dot_dimension_numbers<[1], [0], [0], [1], [0, 0, 1, 1], [], []>} : vector<16x128xbf16>, vector<128x128xbf16>, vector<16x128xf32> -> vector<16x128xf32>
    %84 = arith.addf %78, %83 : vector<16x128xf32>
    %c0_91 = arith.constant 0 : index
    %c0_92 = arith.constant 0 : index
    %c32_93 = arith.constant 32 : index
    %85 = vector.load %arg13[%c0_91, %c0_92, %c32_93] : memref<2x10x160xbf16, #tpu.memory_space<vmem>>, vector<2x8x128xbf16>
    %86 = vector.shape_cast %85 : vector<2x8x128xbf16> to vector<16x128xbf16>
    %c2_94 = arith.constant 2 : index
    %c0_95 = arith.constant 0 : index
    %c0_96 = arith.constant 0 : index
    %87 = vector.load %arg4[%c2_94, %c0_95, %c0_96] : memref<9x128x128xbf16, #tpu.memory_space<vmem>>, vector<1x128x128xbf16>
    %88 = vector.shape_cast %87 : vector<1x128x128xbf16> to vector<128x128xbf16>
    %cst_97 = arith.constant dense<0.000000e+00> : vector<16x128xf32>
    %89 = tpu.matmul %86, %88, %cst_97 {dimension_numbers = #tpu.dot_dimension_numbers<[1], [0], [0], [1], [0, 0, 1, 1], [], []>} : vector<16x128xbf16>, vector<128x128xbf16>, vector<16x128xf32> -> vector<16x128xf32>
    %90 = arith.addf %84, %89 : vector<16x128xf32>
    %c0_98 = arith.constant 0 : index
    %c1_99 = arith.constant 1 : index
    %c0_100 = arith.constant 0 : index
    %91 = vector.load %arg13[%c0_98, %c1_99, %c0_100] : memref<2x10x160xbf16, #tpu.memory_space<vmem>>, vector<2x8x128xbf16>
    %92 = vector.shape_cast %91 : vector<2x8x128xbf16> to vector<16x128xbf16>
    %c3_101 = arith.constant 3 : index
    %c0_102 = arith.constant 0 : index
    %c0_103 = arith.constant 0 : index
    %93 = vector.load %arg4[%c3_101, %c0_102, %c0_103] : memref<9x128x128xbf16, #tpu.memory_space<vmem>>, vector<1x128x128xbf16>
    %94 = vector.shape_cast %93 : vector<1x128x128xbf16> to vector<128x128xbf16>
    %cst_104 = arith.constant dense<0.000000e+00> : vector<16x128xf32>
    %95 = tpu.matmul %92, %94, %cst_104 {dimension_numbers = #tpu.dot_dimension_numbers<[1], [0], [0], [1], [0, 0, 1, 1], [], []>} : vector<16x128xbf16>, vector<128x128xbf16>, vector<16x128xf32> -> vector<16x128xf32>
    %96 = arith.addf %90, %95 : vector<16x128xf32>
    %c0_105 = arith.constant 0 : index
    %c1_106 = arith.constant 1 : index
    %c16_107 = arith.constant 16 : index
    %97 = vector.load %arg13[%c0_105, %c1_106, %c16_107] : memref<2x10x160xbf16, #tpu.memory_space<vmem>>, vector<2x8x128xbf16>
    %98 = vector.shape_cast %97 : vector<2x8x128xbf16> to vector<16x128xbf16>
    %c4_108 = arith.constant 4 : index
    %c0_109 = arith.constant 0 : index
    %c0_110 = arith.constant 0 : index
    %99 = vector.load %arg4[%c4_108, %c0_109, %c0_110] : memref<9x128x128xbf16, #tpu.memory_space<vmem>>, vector<1x128x128xbf16>
    %100 = vector.shape_cast %99 : vector<1x128x128xbf16> to vector<128x128xbf16>
    %cst_111 = arith.constant dense<0.000000e+00> : vector<16x128xf32>
    %101 = tpu.matmul %98, %100, %cst_111 {dimension_numbers = #tpu.dot_dimension_numbers<[1], [0], [0], [1], [0, 0, 1, 1], [], []>} : vector<16x128xbf16>, vector<128x128xbf16>, vector<16x128xf32> -> vector<16x128xf32>
    %102 = arith.addf %96, %101 : vector<16x128xf32>
    %c0_112 = arith.constant 0 : index
    %c1_113 = arith.constant 1 : index
    %c32_114 = arith.constant 32 : index
    %103 = vector.load %arg13[%c0_112, %c1_113, %c32_114] : memref<2x10x160xbf16, #tpu.memory_space<vmem>>, vector<2x8x128xbf16>
    %104 = vector.shape_cast %103 : vector<2x8x128xbf16> to vector<16x128xbf16>
    %c5_115 = arith.constant 5 : index
    %c0_116 = arith.constant 0 : index
    %c0_117 = arith.constant 0 : index
    %105 = vector.load %arg4[%c5_115, %c0_116, %c0_117] : memref<9x128x128xbf16, #tpu.memory_space<vmem>>, vector<1x128x128xbf16>
    %106 = vector.shape_cast %105 : vector<1x128x128xbf16> to vector<128x128xbf16>
    %cst_118 = arith.constant dense<0.000000e+00> : vector<16x128xf32>
    %107 = tpu.matmul %104, %106, %cst_118 {dimension_numbers = #tpu.dot_dimension_numbers<[1], [0], [0], [1], [0, 0, 1, 1], [], []>} : vector<16x128xbf16>, vector<128x128xbf16>, vector<16x128xf32> -> vector<16x128xf32>
    %108 = arith.addf %102, %107 : vector<16x128xf32>
    %c0_119 = arith.constant 0 : index
    %c2_120 = arith.constant 2 : index
    %c0_121 = arith.constant 0 : index
    %109 = vector.load %arg13[%c0_119, %c2_120, %c0_121] : memref<2x10x160xbf16, #tpu.memory_space<vmem>>, vector<2x8x128xbf16>
    %110 = vector.shape_cast %109 : vector<2x8x128xbf16> to vector<16x128xbf16>
    %c6_122 = arith.constant 6 : index
    %c0_123 = arith.constant 0 : index
    %c0_124 = arith.constant 0 : index
    %111 = vector.load %arg4[%c6_122, %c0_123, %c0_124] : memref<9x128x128xbf16, #tpu.memory_space<vmem>>, vector<1x128x128xbf16>
    %112 = vector.shape_cast %111 : vector<1x128x128xbf16> to vector<128x128xbf16>
    %cst_125 = arith.constant dense<0.000000e+00> : vector<16x128xf32>
    %113 = tpu.matmul %110, %112, %cst_125 {dimension_numbers = #tpu.dot_dimension_numbers<[1], [0], [0], [1], [0, 0, 1, 1], [], []>} : vector<16x128xbf16>, vector<128x128xbf16>, vector<16x128xf32> -> vector<16x128xf32>
    %114 = arith.addf %108, %113 : vector<16x128xf32>
    %c0_126 = arith.constant 0 : index
    %c2_127 = arith.constant 2 : index
    %c16_128 = arith.constant 16 : index
    %115 = vector.load %arg13[%c0_126, %c2_127, %c16_128] : memref<2x10x160xbf16, #tpu.memory_space<vmem>>, vector<2x8x128xbf16>
    %116 = vector.shape_cast %115 : vector<2x8x128xbf16> to vector<16x128xbf16>
    %c7_129 = arith.constant 7 : index
    %c0_130 = arith.constant 0 : index
    %c0_131 = arith.constant 0 : index
    %117 = vector.load %arg4[%c7_129, %c0_130, %c0_131] : memref<9x128x128xbf16, #tpu.memory_space<vmem>>, vector<1x128x128xbf16>
    %118 = vector.shape_cast %117 : vector<1x128x128xbf16> to vector<128x128xbf16>
    %cst_132 = arith.constant dense<0.000000e+00> : vector<16x128xf32>
    %119 = tpu.matmul %116, %118, %cst_132 {dimension_numbers = #tpu.dot_dimension_numbers<[1], [0], [0], [1], [0, 0, 1, 1], [], []>} : vector<16x128xbf16>, vector<128x128xbf16>, vector<16x128xf32> -> vector<16x128xf32>
    %120 = arith.addf %114, %119 : vector<16x128xf32>
    %c0_133 = arith.constant 0 : index
    %c2_134 = arith.constant 2 : index
    %c32_135 = arith.constant 32 : index
    %121 = vector.load %arg13[%c0_133, %c2_134, %c32_135] : memref<2x10x160xbf16, #tpu.memory_space<vmem>>, vector<2x8x128xbf16>
    %122 = vector.shape_cast %121 : vector<2x8x128xbf16> to vector<16x128xbf16>
    %c8_136 = arith.constant 8 : index
    %c0_137 = arith.constant 0 : index
    %c0_138 = arith.constant 0 : index
    %123 = vector.load %arg4[%c8_136, %c0_137, %c0_138] : memref<9x128x128xbf16, #tpu.memory_space<vmem>>, vector<1x128x128xbf16>
    %124 = vector.shape_cast %123 : vector<1x128x128xbf16> to vector<128x128xbf16>
    %cst_139 = arith.constant dense<0.000000e+00> : vector<16x128xf32>
    %125 = tpu.matmul %122, %124, %cst_139 {dimension_numbers = #tpu.dot_dimension_numbers<[1], [0], [0], [1], [0, 0, 1, 1], [], []>} : vector<16x128xbf16>, vector<128x128xbf16>, vector<16x128xf32> -> vector<16x128xf32>
    %126 = arith.addf %120, %125 : vector<16x128xf32>
    %c0_140 = arith.constant 0 : index
    %c0_141 = arith.constant 0 : index
    %127 = vector.load %arg5[%c0_140, %c0_141] : memref<1x128xf32, #tpu.memory_space<vmem>>, vector<1x128xf32>
    %128 = vector.broadcast %127 : vector<1x128xf32> to vector<16x128xf32>
    %129 = arith.addf %126, %128 : vector<16x128xf32>
    %130 = vector.shape_cast %129 : vector<16x128xf32> to vector<2x8x128xf32>
    %cst_142 = arith.constant dense<0.000000e+00> : vector<2x128xf32>
    %131 = vector.multi_reduction <add>, %130, %cst_142 [1] : vector<2x8x128xf32> to vector<2x128xf32>
    %c0_143 = arith.constant 0 : index
    %c0_144 = arith.constant 0 : index
    %132 = vector.load %arg10[%c0_143, %c0_144] : memref<128x16xf32, #tpu.memory_space<vmem>>, vector<128x16xf32>
    %cst_145 = arith.constant dense<0.000000e+00> : vector<2x16xf32>
    %133 = tpu.matmul %131, %132, %cst_145 {dimension_numbers = #tpu.dot_dimension_numbers<[1], [0], [0], [1], [0, 0, 1, 1], [], []>} : vector<2x128xf32>, vector<128x16xf32>, vector<2x16xf32> -> vector<2x16xf32>
    %cst_146 = arith.constant 1.562500e-02 : f32
    %134 = vector.broadcast %cst_146 : f32 to vector<2x16xf32>
    %135 = arith.mulf %133, %134 : vector<2x16xf32>
    %c0_147 = arith.constant 0 : index
    %c0_148 = arith.constant 0 : index
    %136 = vector.load %arg6[%c0_147, %c0_148] : memref<16x4xf32, #tpu.memory_space<vmem>>, vector<16x4xf32>
    %cst_149 = arith.constant dense<0.000000e+00> : vector<2x4xf32>
    %137 = tpu.matmul %135, %136, %cst_149 {dimension_numbers = #tpu.dot_dimension_numbers<[1], [0], [0], [1], [0, 0, 1, 1], [], []>} : vector<2x16xf32>, vector<16x4xf32>, vector<2x4xf32> -> vector<2x4xf32>
    %c0_150 = arith.constant 0 : index
    %c0_151 = arith.constant 0 : index
    %138 = vector.load %arg7[%c0_150, %c0_151] : memref<1x4xf32, #tpu.memory_space<vmem>>, vector<1x4xf32>
    %139 = vector.broadcast %138 : vector<1x4xf32> to vector<2x4xf32>
    %140 = arith.addf %137, %139 : vector<2x4xf32>
    %cst_152 = arith.constant 0.000000e+00 : f32
    %141 = vector.broadcast %cst_152 : f32 to vector<2x4xf32>
    %142 = arith.maximumf %140, %141 : vector<2x4xf32>
    %c0_153 = arith.constant 0 : index
    %c0_154 = arith.constant 0 : index
    %143 = vector.load %arg8[%c0_153, %c0_154] : memref<4x16xf32, #tpu.memory_space<vmem>>, vector<4x16xf32>
    %cst_155 = arith.constant dense<0.000000e+00> : vector<2x16xf32>
    %144 = tpu.matmul %142, %143, %cst_155 {dimension_numbers = #tpu.dot_dimension_numbers<[1], [0], [0], [1], [0, 0, 1, 1], [], []>} : vector<2x4xf32>, vector<4x16xf32>, vector<2x16xf32> -> vector<2x16xf32>
    %c0_156 = arith.constant 0 : index
    %c0_157 = arith.constant 0 : index
    %145 = vector.load %arg9[%c0_156, %c0_157] : memref<1x16xf32, #tpu.memory_space<vmem>>, vector<1x16xf32>
    %146 = vector.broadcast %145 : vector<1x16xf32> to vector<2x16xf32>
    %147 = arith.addf %144, %146 : vector<2x16xf32>
    %148 = arith.negf %147 : vector<2x16xf32>
    %149 = math.exp %148 : vector<2x16xf32>
    %cst_158 = arith.constant 1.000000e+00 : f32
    %150 = vector.broadcast %cst_158 : f32 to vector<2x16xf32>
    %151 = arith.addf %150, %149 : vector<2x16xf32>
    %152 = arith.divf %150, %151 : vector<2x16xf32>
    %c0_159 = arith.constant 0 : index
    %c0_160 = arith.constant 0 : index
    %153 = vector.load %arg11[%c0_159, %c0_160] : memref<16x128xf32, #tpu.memory_space<vmem>>, vector<16x128xf32>
    %cst_161 = arith.constant dense<0.000000e+00> : vector<2x128xf32>
    %154 = tpu.matmul %152, %153, %cst_161 {dimension_numbers = #tpu.dot_dimension_numbers<[1], [0], [0], [1], [0, 0, 1, 1], [], []>} : vector<2x16xf32>, vector<16x128xf32>, vector<2x128xf32> -> vector<2x128xf32>
    %155 = vector.shape_cast %154 : vector<2x128xf32> to vector<2x1x128xf32>
    %156 = vector.broadcast %155 : vector<2x1x128xf32> to vector<2x8x128xf32>
    %157 = arith.mulf %130, %156 : vector<2x8x128xf32>
    %158 = arith.addf %157, %6 : vector<2x8x128xf32>
    %c0_162 = arith.constant 0 : index
    %c0_163 = arith.constant 0 : index
    %c0_164 = arith.constant 0 : index
    %159 = vector.load %arg12[%c0_162, %c0_163, %c0_164] : memref<2x8x128xf32, #tpu.memory_space<vmem>>, vector<2x8x128xf32>
    tpu.vector_store %arg12[%c0_162, %c0_163, %c0_164], %158 {strides = array<i32>} : memref<2x8x128xf32, #tpu.memory_space<vmem>>, vector<2x8x128xf32>,
    return
  }
  func.func @transform_0(%arg0: i32) -> (i32, i32, i32) {
    %c0_i32 = arith.constant 0 : i32
    %c0_i32_0 = arith.constant 0 : i32
    %c0_i32_1 = arith.constant 0 : i32
    return %arg0, %c0_i32, %c0_i32_0 : i32, i32, i32
  }
  func.func @transform_1(%arg0: i32) -> (i32, i32, i32) {
    %c0_i32 = arith.constant 0 : i32
    %c0_i32_0 = arith.constant 0 : i32
    %c0_i32_1 = arith.constant 0 : i32
    %c0_i32_2 = arith.constant 0 : i32
    return %c0_i32, %c0_i32_0, %c0_i32_1 : i32, i32, i32
  }
  func.func @transform_2(%arg0: i32) -> (i32, i32) {
    %c0_i32 = arith.constant 0 : i32
    %c0_i32_0 = arith.constant 0 : i32
    %c0_i32_1 = arith.constant 0 : i32
    return %c0_i32, %c0_i32_0 : i32, i32
  }
  func.func @transform_3(%arg0: i32) -> (i32, i32, i32) {
    %c0_i32 = arith.constant 0 : i32
    %c0_i32_0 = arith.constant 0 : i32
    %c0_i32_1 = arith.constant 0 : i32
    %c0_i32_2 = arith.constant 0 : i32
    return %c0_i32, %c0_i32_0, %c0_i32_1 : i32, i32, i32
  }
  func.func @transform_4(%arg0: i32) -> (i32, i32) {
    %c0_i32 = arith.constant 0 : i32
    %c0_i32_0 = arith.constant 0 : i32
    %c0_i32_1 = arith.constant 0 : i32
    return %c0_i32, %c0_i32_0 : i32, i32
  }
  func.func @transform_5(%arg0: i32) -> (i32, i32) {
    %c0_i32 = arith.constant 0 : i32
    %c0_i32_0 = arith.constant 0 : i32
    %c0_i32_1 = arith.constant 0 : i32
    return %c0_i32, %c0_i32_0 : i32, i32
  }
  func.func @transform_6(%arg0: i32) -> (i32, i32) {
    %c0_i32 = arith.constant 0 : i32
    %c0_i32_0 = arith.constant 0 : i32
    %c0_i32_1 = arith.constant 0 : i32
    return %c0_i32, %c0_i32_0 : i32, i32
  }
  func.func @transform_7(%arg0: i32) -> (i32, i32) {
    %c0_i32 = arith.constant 0 : i32
    %c0_i32_0 = arith.constant 0 : i32
    %c0_i32_1 = arith.constant 0 : i32
    return %c0_i32, %c0_i32_0 : i32, i32
  }
  func.func @transform_8(%arg0: i32) -> (i32, i32) {
    %c0_i32 = arith.constant 0 : i32
    %c0_i32_0 = arith.constant 0 : i32
    %c0_i32_1 = arith.constant 0 : i32
    return %c0_i32, %c0_i32_0 : i32, i32
  }
  func.func @transform_9(%arg0: i32) -> (i32, i32) {
    %c0_i32 = arith.constant 0 : i32
    %c0_i32_0 = arith.constant 0 : i32
    %c0_i32_1 = arith.constant 0 : i32
    return %c0_i32, %c0_i32_0 : i32, i32
  }
  func.func @transform_10(%arg0: i32) -> (i32, i32) {
    %c0_i32 = arith.constant 0 : i32
    %c0_i32_0 = arith.constant 0 : i32
    %c0_i32_1 = arith.constant 0 : i32
    return %c0_i32, %c0_i32_0 : i32, i32
  }
  func.func @transform_11(%arg0: i32) -> (i32, i32, i32) {
    %c0_i32 = arith.constant 0 : i32
    %c0_i32_0 = arith.constant 0 : i32
    %c0_i32_1 = arith.constant 0 : i32
    return %arg0, %c0_i32, %c0_i32_0 : i32, i32, i32
  }
}

</mosaic_0001>

<bundles_post_ra>
// kernel: tile.39
= control target key start
LH: loop header
LB: loop body
LE: loop exit
PB: predicated region body
PF: predicated region fallthrough
CT: control target
= control target key end

     0   :  { %vm4_vm0 = vcmask 1047556   ;;  %s209_s14 = smov 96   ;;  %s210_s19 = smov 112   ;;  %vm6_vm1 = vcmask 130048   ;;  %vm25_vm2 = vcmask 1048448   ;;  %vm46_vm3 = vcmask 917248   ;;  %s388_s0 = inlined_call_operand.vmem [shape: f32[16,8,16], index: 0, kind: input, shape index: {}]   ;;  %s389_s1 = inlined_call_operand.vmem [shape: f32[16,128], index: 1, kind: output, shape index: {}]  }
   0x1   :  { %v172_v0 = vld [vmem:[%s388_s0 + $0x6] ss:$8 sm:$0xf]   ;;  %v167_v3 = vld [vmem:[%s388_s0 + $0x7] ss:$8 sm:$0xf]  }
   0x2   :  { %v173_v1 = vld [vmem:[%s388_s0 + $0x6] ss:$8 sm:$0xf0]   ;;  %v168_v4 = vld [vmem:[%s388_s0 + $0x7] ss:$8 sm:$0xf0]  }
   0x3   :  { %v43_v2 = vsel %vm4_vm0, %v173_v1, %v172_v0  ;;  %v22_v5 = vsel %vm4_vm0, %v168_v4, %v167_v3  ;;  %v174_v6 = vld [vmem:[%s388_s0 + $0x46] ss:$8 sm:$0xf]   ;;  %v169_v9 = vld [vmem:[%s388_s0 + $0x47] ss:$8 sm:$0xf]  }
   0x4   :  { %44 = vrot.lane.b32.xlu1 %v43_v2, %s209_s14  ;;  %v175_v7 = vld [vmem:[%s388_s0 + $0x46] ss:$8 sm:$0xf0]   ;;  %23 = vrot.lane.b32.xlu0 %v22_v5, %s210_s19  ;;  %v170_v10 = vld [vmem:[%s388_s0 + $0x47] ss:$8 sm:$0xf0]  }
   0x5   :  { %v53_v8 = vsel %vm4_vm0, %v175_v7, %v174_v6  ;;  %v32_v11 = vsel %vm4_vm0, %v170_v10, %v169_v9  ;;  %v179_v12 = vld [vmem:[%s388_s0 + $0x45] ss:$8 sm:$0xf]   ;;  %v184_v18 = vld [vmem:[%s388_s0 + $0x44] ss:$8 sm:$0xf]  }
   0x6   :  { %v180_v13 = vld [vmem:[%s388_s0 + $0x45] ss:$8 sm:$0xf0]   ;;  %v185_v19 = vld [vmem:[%s388_s0 + $0x44] ss:$8 sm:$0xf0]  }
   0x7   :  { %v177_v14 = vld [vmem:[%s388_s0 + $0x5] ss:$8 sm:$0xf]   ;;  %v74_v16 = vsel %vm4_vm0, %v180_v13, %v179_v12  ;;  %v182_v20 = vld [vmem:[%s388_s0 + $0x4] ss:$8 sm:$0xf]   ;;  %v95_v22 = vsel %vm4_vm0, %v185_v19, %v184_v18 }
   0x8   :  { %54 = vrot.lane.b32.xlu1 %v53_v8, %s209_s14  ;;  %v178_v15 = vld [vmem:[%s388_s0 + $0x5] ss:$8 sm:$0xf0]   ;;  %33 = vrot.lane.b32.xlu0 %v32_v11, %s210_s19  ;;  %v183_v21 = vld [vmem:[%s388_s0 + $0x4] ss:$8 sm:$0xf0]  }
   0x9   :  { %v64_v17 = vsel %vm4_vm0, %v178_v15, %v177_v14  ;;  %s211_s11 = smov 80   ;;  %v85_v23 = vsel %vm4_vm0, %v183_v21, %v182_v20  ;;  %v189_v24 = vld [vmem:[%s388_s0 + $0x43] ss:$8 sm:$0xf]   ;;  %s212_s20 = smov 64   ;;  %vm67_vm4 = vcmask 786048  }
   0xa   :  { %v190_v25 = vld [vmem:[%s388_s0 + $0x43] ss:$8 sm:$0xf0]   ;;  %v194_v28 = vld [vmem:[%s388_s0 + $0x42] ss:$8 sm:$0xf]  }
   0xb   :  { %v187_v26 = vld [vmem:[%s388_s0 + $0x3] ss:$8 sm:$0xf]   ;;  %v195_v29 = vld [vmem:[%s388_s0 + $0x42] ss:$8 sm:$0xf0]   ;;  %v116_v30 = vsel %vm4_vm0, %v190_v25, %v189_v24 }
   0xc   :  { %75 = vrot.lane.b32.xlu1 %v74_v16, %s211_s11  ;;  %65 = vrot.lane.b32.xlu0 %v64_v17, %s211_s11  ;;  %v188_v27 = vld [vmem:[%s388_s0 + $0x3] ss:$8 sm:$0xf0]   ;;  %v192_v31 = vld [vmem:[%s388_s0 + $0x2] ss:$8 sm:$0xf]   ;;  %v137_v40 = vsel %vm4_vm0, %v195_v29, %v194_v28 }
   0xd   :  { %v2_v32 = vld [vmem:[%s388_s0] ss:$8 sm:$0xf]   ;;  %v106_v33 = vsel %vm4_vm0, %v188_v27, %v187_v26  ;;  %v193_v36 = vld [vmem:[%s388_s0 + $0x2] ss:$8 sm:$0xf0]  }
   0xe   :  { %v3_v34 = vld [vmem:[%s388_s0] ss:$8 sm:$0xf0]   ;;  %s213_s8 = smov 48   ;;  %v127_v41 = vsel %vm4_vm0, %v193_v36, %v192_v31  ;;  %s215_s21 = smov 16   ;;  %vm88_vm5 = vcmask 654848  }
   0xf   :  { %v164_v35 = vld [vmem:[%s388_s0 + $0x40] ss:$8 sm:$0xf]   ;;  %v5_v37 = vsel %vm4_vm0, %v3_v34, %v2_v32  ;;  %v199_v42 = vld [vmem:[%s388_s0 + $0x41] ss:$8 sm:$0xf]  }
  0x10   :  { %96 = vrot.lane.b32.xlu1 %v95_v22, %s212_s20  ;;  %86 = vrot.lane.b32.xlu0 %v85_v23, %s212_s20  ;;  %v165_v38 = vld [vmem:[%s388_s0 + $0x40] ss:$8 sm:$0xf0]   ;;  %7 = vst.msk [vmem:[%s389_s1] sm:$0xff] %vm6_vm1, %v5_v37   ;;  %vm109_vm6 = vcmask 523648   ;;  %vm130_vm7 = vcmask 392448  }
  0x11   :  { %v13_v39 = vsel %vm4_vm0, %v165_v38, %v164_v35  ;;  %v200_v43 = vld [vmem:[%s388_s0 + $0x41] ss:$8 sm:$0xf0]   ;;  %vm151_vm8 = vcmask 261248  }
  0x12   :  { %166 = vst.msk [vmem:[%s389_s1 + $0x8] sm:$0xff] %vm6_vm1, %v13_v39   ;;  %v197_v44 = vld [vmem:[%s388_s0 + $0x1] ss:$8 sm:$0xf]   ;;  %v158_v46 = vsel %vm4_vm0, %v200_v43, %v199_v42 }
  0x13   :  { %v198_v45 = vld [vmem:[%s388_s0 + $0x1] ss:$8 sm:$0xf0]   ;;  %s214_s0 = smov 32  }
  0x14   :  { %117 = vrot.lane.b32.xlu1 %v116_v30, %s213_s8  ;;  %107 = vrot.lane.b32.xlu0 %v106_v33, %s213_s8  ;;  %v148_v47 = vsel %vm4_vm0, %v198_v45, %v197_v44 }
  0x18   :  { %138 = vrot.lane.b32.xlu1 %v137_v40, %s214_s0  ;;  %128 = vrot.lane.b32.xlu0 %v127_v41, %s214_s0 }
  0x1c   :  { %159 = vrot.lane.b32.xlu1 %v158_v46, %s215_s21  ;;  %149 = vrot.lane.b32.xlu0 %v148_v47, %s215_s21 }
  0x76   :  { %v45_v48 = vpop.permute.xlu1 %44   ;;  %v24_v49 = vpop.permute.xlu0 %23  }
  0x77   :  { %26 = vst.msk [vmem:[%s389_s1] sm:$0xff] %vm25_vm2, %v24_v49  }
  0x78   :  { %47 = vst.msk [vmem:[%s389_s1] sm:$0xff] %vm46_vm3, %v45_v48  }
  0x7a   :  { %v55_v50 = vpop.permute.xlu1 %54   ;;  %v34_v51 = vpop.permute.xlu0 %33  }
  0x7b   :  { %171 = vst.msk [vmem:[%s389_s1 + $0x8] sm:$0xff] %vm25_vm2, %v34_v51  }
  0x7c   :  { %176 = vst.msk [vmem:[%s389_s1 + $0x8] sm:$0xff] %vm46_vm3, %v55_v50  }
  0x7e   :  { %v76_v52 = vpop.permute.xlu1 %75   ;;  %v66_v53 = vpop.permute.xlu0 %65  }
  0x7f   :  { %181 = vst.msk [vmem:[%s389_s1 + $0x8] sm:$0xff] %vm67_vm4, %v76_v52   ;;  %68 = vst.msk [vmem:[%s389_s1] sm:$0xff] %vm67_vm4, %v66_v53  }
  0x82   :  { %v97_v54 = vpop.permute.xlu1 %96   ;;  %v87_v55 = vpop.permute.xlu0 %86  }
  0x83   :  { %186 = vst.msk [vmem:[%s389_s1 + $0x8] sm:$0xff] %vm88_vm5, %v97_v54   ;;  %89 = vst.msk [vmem:[%s389_s1] sm:$0xff] %vm88_vm5, %v87_v55  }
  0x86   :  { %v118_v56 = vpop.permute.xlu1 %117   ;;  %v108_v57 = vpop.permute.xlu0 %107  }
  0x87   :  { %191 = vst.msk [vmem:[%s389_s1 + $0x8] sm:$0xff] %vm109_vm6, %v118_v56   ;;  %110 = vst.msk [vmem:[%s389_s1] sm:$0xff] %vm109_vm6, %v108_v57  }
  0x8a   :  { %v139_v58 = vpop.permute.xlu1 %138   ;;  %v129_v59 = vpop.permute.xlu0 %128  }
  0x8b   :  { %196 = vst.msk [vmem:[%s389_s1 + $0x8] sm:$0xff] %vm130_vm7, %v139_v58   ;;  %131 = vst.msk [vmem:[%s389_s1] sm:$0xff] %vm130_vm7, %v129_v59  }
  0x8e   :  { %v160_v60 = vpop.permute.xlu1 %159   ;;  %v150_v61 = vpop.permute.xlu0 %149  }
  0x8f   :  { %201 = vst.msk [vmem:[%s389_s1 + $0x8] sm:$0xff] %vm151_vm8, %v160_v60   ;;  %152 = vst.msk [vmem:[%s389_s1] sm:$0xff] %vm151_vm8, %v150_v61  }

// kernel: tile.23
= control target key start
LH: loop header
LB: loop body
LE: loop exit
PB: predicated region body
PF: predicated region fallthrough
CT: control target
= control target key end

     0   :  { %s22_s0 = inlined_call_operand.vmem [shape: f32[16], index: 0, kind: input, shape index: {}]   ;;  %s23_s1 = inlined_call_operand.vmem [shape: f32[8,16], index: 1, kind: output, shape index: {}]  }
   0x1   :  { %v4_v0 = vld [vmem:[%s22_s0] ss:$0 sm:$0xff] }
   0x2   :  { %5 = vst [vmem:[%s23_s1] sm:$0xff] %v4_v0 }

// kernel: tile.24
= control target key start
LH: loop header
LB: loop body
LE: loop exit
PB: predicated region body
PF: predicated region fallthrough
CT: control target
= control target key end

     0   :  { %s69_s10 = smov 112   ;;  %s70_s11 = smov 80   ;;  %vm3_vm0 = vcmask 130048   ;;  %vm9_vm1 = vcmask 1048448   ;;  %vm15_vm2 = vcmask 917248   ;;  %vm21_vm3 = vcmask 786048   ;;  %s113_s0 = inlined_call_operand.vmem [shape: f32[8,16], index: 0, kind: input, shape index: {}]   ;;  %s114_s1 = inlined_call_operand.vmem [shape: f32[1,128], index: 1, kind: output, shape index: {}]  }
   0x1   :  { %v55_v0 = vld [vmem:[%s113_s0 + $0x7] sm:$0x1]   ;;  %v57_v1 = vld [vmem:[%s113_s0 + $0x5] sm:$0x1]   ;;  %v56_v2 = vld [vmem:[%s113_s0 + $0x6] sm:$0x1]  }
   0x2   :  { %7 = vrot.lane.b32.xlu0 %v55_v0, %s69_s10  ;;  %19 = vrot.lane.b32.xlu1 %v57_v1, %s70_s11  ;;  %v58_v3 = vld [vmem:[%s113_s0 + $0x4] sm:$0x1]   ;;  %v2_v4 = vld [vmem:[%s113_s0] sm:$0x1]   ;;  %s71_s18 = smov 96   ;;  %s72_s19 = smov 64  }
   0x3   :  { %4 = vst.msk [vmem:[#allocation0] sm:$0x1] %vm3_vm0, %v2_v4   ;;  %v59_v5 = vld [vmem:[%s113_s0 + $0x3] sm:$0x1]   ;;  %v60_v6 = vld [vmem:[%s113_s0 + $0x2] sm:$0x1]  }
   0x4   :  { %s73_s24 = smov 48   ;;  %s74_s25 = smov 32   ;;  %v61_v7 = vld [vmem:[%s113_s0 + $0x1] sm:$0x1]   ;;  %vm27_vm4 = vcmask 654848   ;;  %vm33_vm5 = vcmask 523648  }
   0x5   :  { %s75_s0 = smov 16   ;;  %vm39_vm6 = vcmask 392448   ;;  %vm45_vm7 = vcmask 261248  }
   0x6   :  { %13 = vrot.lane.b32.xlu0 %v56_v2, %s71_s18  ;;  %25 = vrot.lane.b32.xlu1 %v58_v3, %s72_s19 }
   0xa   :  { %31 = vrot.lane.b32.xlu0 %v59_v5, %s73_s24  ;;  %37 = vrot.lane.b32.xlu1 %v60_v6, %s74_s25 }
   0xe   :  { %43 = vrot.lane.b32.xlu0 %v61_v7, %s75_s0 }
  0x74   :  { %v8_v8 = vpop.permute.xlu0 %7   ;;  %v20_v9 = vpop.permute.xlu1 %19  }
  0x75   :  { %10 = vst.msk [vmem:[#allocation0] sm:$0x1] %vm9_vm1, %v8_v8  }
  0x78   :  { %v14_v10 = vpop.permute.xlu0 %13   ;;  %v26_v11 = vpop.permute.xlu1 %25  }
  0x79   :  { %16 = vst.msk [vmem:[#allocation0] sm:$0x1] %vm15_vm2, %v14_v10  }
  0x7a   :  { %22 = vst.msk [vmem:[#allocation0] sm:$0x1] %vm21_vm3, %v20_v9  }
  0x7b   :  { %28 = vst.msk [vmem:[#allocation0] sm:$0x1] %vm27_vm4, %v26_v11  }
  0x7c   :  { %v32_v12 = vpop.permute.xlu0 %31   ;;  %v38_v13 = vpop.permute.xlu1 %37  }
  0x7d   :  { %34 = vst.msk [vmem:[#allocation0] sm:$0x1] %vm33_vm5, %v32_v12  }
  0x7e   :  { %40 = vst.msk [vmem:[#allocation0] sm:$0x1] %vm39_vm6, %v38_v13  }
  0x80   :  { %v44_v14 = vpop.permute.xlu0 %43  }
  0x81   :  { %46 = vst.msk [vmem:[#allocation0] sm:$0x1] %vm45_vm7, %v44_v14  }
  0x88   :  { %v51_v15 = vld [vmem:[#allocation0] sm:$0x1] }
  0x89   :  { %54 = vst [vmem:[%s114_s1] sm:$0x1] %v51_v15 }

// kernel: rcab_pallas.1
= control target key start
LH: loop header
LB: loop body
LE: loop exit
PB: predicated region body
PF: predicated region fallthrough
CT: control target
= control target key end

     0   :  { %vm39_vm0 = vcmask 1040384   ;;  %v4095_v2 = vmov 0.0   ;;  %vm40_vm1 = vsmask.f32 256  ;;  %vm42_vm2 = vcmask 258052   ;;  %s4096_s27 = smov 16   ;;  %s5121_s0 = inlined_call_operand.vmem [shape: f32[2,8,128], index: 0, kind: input, shape index: {}]   ;;  %s5122_s1 = inlined_call_operand.vmem [shape: bf16[9,128,128], index: 1, kind: input, shape index: {}]   ;;  %s5123_s3 = inlined_call_operand.vmem [shape: bf16[9,128,128], index: 3, kind: input, shape index: {}]   ;;  %s5124_s2 = inlined_call_operand.vmem [shape: f32[1,128], index: 2, kind: input, shape index: {}]   ;;  %s5125_s9 = inlined_call_operand.vmem [shape: f32[128,16], index: 9, kind: input, shape index: {}]   ;;  %s5126_s5 = inlined_call_operand.vmem [shape: f32[16,4], index: 5, kind: input, shape index: {}]   ;;  %s5127_s4 = inlined_call_operand.vmem [shape: f32[1,128], index: 4, kind: input, shape index: {}]   ;;  %s5128_s7 = inlined_call_operand.vmem [shape: f32[4,16], index: 7, kind: input, shape index: {}]   ;;  %s5129_s6 = inlined_call_operand.vmem [shape: f32[1,4], index: 6, kind: input, shape index: {}]   ;;  %s5130_s10 = inlined_call_operand.vmem [shape: f32[16,128], index: 10, kind: input, shape index: {}]   ;;  %s5131_s8 = inlined_call_operand.vmem [shape: f32[1,16], index: 8, kind: input, shape index: {}]   ;;  %s5132_s11 = inlined_call_operand.vmem [shape: f32[2,8,128], index: 11, kind: output, shape index: {}]  }
   0x1   :  { %v75_v0 = vld [vmem:[%s5121_s0] sm:$0xff]  ;;  %v76_v1 = vld [vmem:[%s5121_s0 + $0x8] sm:$0xff]  ;;  %3541 = vmatprep.subr.bf16.mxu1 %v4095_v2  ;;  %3521 = vmatprep.subr.bf16.mxu0 %v4095_v2  ;;  %v3942_v5 = vld [vmem:[%s5122_s1 + $0x38] sm:$0xff]   ;;  %vm43_vm3 = vsmask.f32 4352  ;;  %vm65_vm5 = vcmask 122880  }
   0x2   :  { %v3330_v3 = vpack.c.bf16 %v75_v0, %v75_v0  ;;  %v3331_v4 = vpack.c.bf16 %v76_v1, %v76_v1  ;;  %3542 = vmatpush3.bf16.msra.mxu1 %v3942_v5  ;;  %v3943_v9 = vld [vmem:[%s5122_s1 + $0x30] sm:$0xff]   ;;  %vm4178_vm4 = vmand %vm39_vm0, %vm40_vm1  ;;  %v3944_v14 = vld [vmem:[%s5122_s1 + $0x28] sm:$0xff]   ;;  %vm52_vm8 = vsmask.f32 7938  ;;  %vm54_vm9 = vsmask.f32 7954 }
   0x3   :  { %3543 = vmatprep.subr.bf16.mxu1 %v4095_v2  ;;  %vm4188_vm6 = vmand %vm42_vm2, %vm43_vm3  ;;  %v46_v16 = vld [vmem:[#allocation2] sm:$0x11]  ;;  %v49_v17 = vld [vmem:[#allocation2 + $0x10] sm:$0x11]  ;;  %vm71_vm11 = vcmask 254080   ;;  %vm130_vm13 = vcmask 1040512  }
   0x4   :  { %v86_v6 = vshrl.u32 %v3330_v3, 16  ;;  %v89_v7 = vshll.u32 %v3330_v3, 16  ;;  %v94_v8 = vshrl.u32 %v3331_v4, 16  ;;  %v97_v13 = vshll.u32 %v3331_v4, 16  ;;  %vm45_vm7 = vmor %vm4188_vm6, %vm4178_vm4  ;;  %v57_v21 = vld [vmem:[#allocation2 + $0x8] sm:$0x11] }
   0x5   :  { %vm4198_vm10 = vmand %vm39_vm0, %vm52_vm8  ;;  %v60_v22 = vld [vmem:[#allocation2 + $0x18] sm:$0x11]  ;;  %v47_v23 = vsel %vm45_vm7, 0, %v46_v16  ;;  %v50_v24 = vsel %vm45_vm7, 0, %v49_v17  ;;  %vm132_vm14 = vcmask 126980   ;;  %vm63_vm0 = vcmask 125952  }
   0x6   :  { %v88_v11 = vrot.slane %v86_v6, 7  ;;  %v96_v12 = vrot.slane %v94_v8, 7  ;;  %3544 = vmatpush3.bf16.msra.mxu1 %v3943_v9  ;;  %vm55_vm12 = vmand %vm42_vm2, %vm54_vm9  ;;  %48 = vst [vmem:[#allocation2] sm:$0x11] %v47_v23  ;;  %vm69_vm4 = vcmask 257152   ;;  %v4097_v30 = vmov 0  }
   0x7   :  { %3545 = vmatprep.subr.bf16.mxu1 %v4095_v2  ;;  %51 = vst [vmem:[#allocation2 + $0x10] sm:$0x11] %v50_v24  ;;  %vm56_vm15 = vmor %vm55_vm12, %vm4198_vm10  ;;  %vm122_vm6 = vcmask 1043584   ;;  %v3945_v31 = vld [vmem:[%s5122_s1 + $0x20] sm:$0xff]   ;;  %vm4098_vm10 = vmmov 0   ;;  %v3946_v33 = vld [vmem:[%s5122_s1 + $0x18] sm:$0xff]  }
   0x8   :  { %v92_v18 = vrot.slane %v88_v11, 4  ;;  %v91_v19 = vor.u32 %v89_v7, %v88_v11  ;;  %v100_v25 = vrot.slane %v96_v12, 4  ;;  %v99_v26 = vor.u32 %v97_v13, %v96_v12  ;;  %vm4210_vm2 = vmand %vm130_vm13, %vm40_vm1  ;;  %64 = vst.msk [vmem:[#allocation2] sm:$0xf] %vm63_vm0, %v4097_v30  ;;  %3557 = vmatprep.mubr.msk.bf16.mxu1 %vm4098_vm10, %v4095_v2  ;;  %3537 = vmatprep.mubr.msk.bf16.mxu0 %vm4098_vm10, %v4095_v2  ;;  %v3947_v35 = vld [vmem:[%s5122_s1 + $0x10] sm:$0xff]   ;;  %v3948_v36 = vld [vmem:[%s5122_s1 + $0x8] sm:$0xff]  }
   0x9   :  { %v58_v27 = vsel %vm56_vm15, 0, %v57_v21  ;;  %v61_v28 = vsel %vm56_vm15, 0, %v60_v22  ;;  %70 = vst.msk [vmem:[#allocation2 + $0x4] sm:$0xf] %vm69_vm4, %v4097_v30  ;;  %73 = vst.msk [vmem:[#allocation2 + $0x14] sm:$0xf] %vm69_vm4, %v4097_v30 }
   0xa   :  { %103 = vrot.lane.b32.xlu1 %v92_v18, %s4096_s27  ;;  %101 = vrot.lane.b32.xlu0 %v91_v19, %s4096_s27  ;;  %67 = vst.msk [vmem:[#allocation2 + $0x10] sm:$0xf] %vm63_vm0, %v4097_v30  ;;  %59 = vst [vmem:[#allocation2 + $0x8] sm:$0x11] %v58_v27  ;;  %vm124_vm1 = vcmask 130052   ;;  %v3949_v37 = vld [vmem:[%s5122_s1] sm:$0xff]  }
   0xb   :  { %3546 = vmatpush3.bf16.msra.mxu1 %v3944_v14  ;;  %62 = vst [vmem:[#allocation2 + $0x18] sm:$0x11] %v61_v28  ;;  %vm133_vm7 = vmand %vm132_vm14, %vm43_vm3  ;;  %v3959_v38 = vld [vmem:[%s5122_s1 + $0x78] sm:$0xff]   ;;  %v3960_v39 = vld [vmem:[%s5122_s1 + $0x70] sm:$0xff]   ;;  %s4099_s17 = smov 112   ;;  %s4100_s20 = smov 96  }
   0xc   :  { %3547 = vmatprep.subr.bf16.mxu1 %v4095_v2  ;;  %66 = vst.msk [vmem:[#allocation2 + $0x8] sm:$0x1] %vm65_vm5, %v4097_v30  ;;  %vm4226_vm12 = vmor %vm133_vm7, %vm4210_vm2  ;;  %3522 = vmatpush3.bf16.msra.mxu0 %v3959_v38  ;;  %v3961_v40 = vld [vmem:[%s5122_s1 + $0x68] sm:$0xff]   ;;  %v3962_v41 = vld [vmem:[%s5122_s1 + $0x60] sm:$0xff]   ;;  %vm914_vm15 = vcmask 1042432   ;;  %vm915_vm0 = vcmask 1046532  }
   0xd   :  { %72 = vst.msk [vmem:[#allocation2 + $0xc] sm:$0x1] %vm71_vm11, %v4097_v30  ;;  %74 = vst.msk [vmem:[#allocation2 + $0x1c] sm:$0x1] %vm71_vm11, %v4097_v30  ;;  %3523 = vmatprep.subr.bf16.mxu0 %v4095_v2  ;;  %v3964_v42 = vld [vmem:[%s5122_s1 + $0x58] sm:$0xff]   ;;  %v3966_v43 = vld [vmem:[%s5122_s1 + $0x50] sm:$0xff]  }
   0xe   :  { %68 = vst.msk [vmem:[#allocation2 + $0x18] sm:$0x1] %vm65_vm5, %v4097_v30  ;;  %107 = vrot.lane.b32.xlu1 %v100_v25, %s4096_s27  ;;  %105 = vrot.lane.b32.xlu0 %v99_v26, %s4096_s27  ;;  %vm123_vm3 = vmand %vm122_vm6, %vm52_vm8  ;;  %v3968_v44 = vld [vmem:[%s5122_s1 + $0x48] sm:$0xff]   ;;  %v3970_v45 = vld [vmem:[%s5122_s1 + $0x40] sm:$0xff]   ;;  %vm113_vm8 = vcmask 130048   ;;  %vm193_vm2 = vcmask 916480  }
   0xf   :  { %vm125_vm13 = vmand %vm124_vm1, %vm54_vm9  ;;  %3548 = vmatpush3.bf16.msra.mxu1 %v3945_v31  ;;  %v3951_v15 = vld [vmem:[%s5122_s1 + $0xf8] sm:$0xff]   ;;  %vm499_vm9 = vsmask.f32 3328  ;;  %vm500_vm11 = vsmask.f32 7440  ;;  %v3952_v23 = vld [vmem:[%s5122_s1 + $0xf0] sm:$0xff]  }
  0x10   :  { %vm4242_vm5 = vmor %vm125_vm13, %vm123_vm3  ;;  %3549 = vmatprep.subr.bf16.mxu1 %v4095_v2  ;;  %3524 = vmatpush3.bf16.msra.mxu0 %v3960_v39  ;;  %v127_v50 = vld [vmem:[#allocation2] sm:$0xff]  ;;  %vm401_vm6 = vcmask 785408   ;;  %v4025_v32 = vld [vmem:[%s5123_s3 + $0xf0] sm:$0xff]   ;;  %vm2523_vm7 = vcmask 1041409   ;;  %vm2693_vm1 = vcmask 1043456  }
  0x11   :  { %3525 = vmatprep.subr.bf16.mxu0 %v4095_v2  ;;  %v138_v60 = vld [vmem:[#allocation2 + $0x10] sm:$0xff]  ;;  %vm4311_vm14 = vmor %vm499_vm9, %vm500_vm11  ;;  %v4040_v22 = vld [vmem:[%s5123_s3 + $0x168] sm:$0xff]  }
  0x12   :  { %vm4331_vm4 = vmor %vm914_vm15, %vm915_vm0 }
  0x13   :  { %3550 = vmatpush3.bf16.msra.mxu1 %v3946_v33 }
  0x14   :  { %3551 = vmatprep.subr.bf16.mxu1 %v4095_v2  ;;  %3526 = vmatpush3.bf16.msra.mxu0 %v3961_v40  ;;  %v135_v48 = vld [vmem:[#allocation2 + $0x8] sm:$0x11] }
  0x15   :  { %3527 = vmatprep.subr.bf16.mxu0 %v4095_v2  ;;  %v141_v58 = vld [vmem:[#allocation2 + $0x18] sm:$0x11] }
  0x17   :  { %3552 = vmatpush3.bf16.msra.mxu1 %v3947_v35  ;;  %v3953_v35 = vld [vmem:[%s5122_s1 + $0xe8] sm:$0xff]  }
  0x18   :  { %3553 = vmatprep.subr.bf16.mxu1 %v4095_v2  ;;  %3528 = vmatpush3.bf16.msra.mxu0 %v3962_v41 }
  0x19   :  { %3529 = vmatprep.subr.bf16.mxu0 %v4095_v2 }
  0x1b   :  { %3554 = vmatpush3.bf16.msra.mxu1 %v3948_v36 }
  0x1c   :  { %3555 = vmatprep.subr.bf16.mxu1 %v4095_v2  ;;  %3530 = vmatpush3.bf16.msra.mxu0 %v3964_v42  ;;  %v3954_v42 = vld [vmem:[%s5122_s1 + $0xe0] sm:$0xff]  }
  0x1d   :  { %3531 = vmatprep.subr.bf16.mxu0 %v4095_v2 }
  0x1f   :  { %3556 = vmatpush3.bf16.msra.mxu1 %v3949_v37 }
  0x20   :  { %3581 = vmatprep.subr.bf16.mxu1 %v4095_v2  ;;  %3532 = vmatpush3.bf16.msra.mxu0 %v3966_v43 }
  0x21   :  { %3533 = vmatprep.subr.bf16.mxu0 %v4095_v2 }
  0x24   :  { %3534 = vmatpush3.bf16.msra.mxu0 %v3968_v44 }
  0x25   :  { %3535 = vmatprep.subr.bf16.mxu0 %v4095_v2 }
  0x28   :  { %3536 = vmatpush3.bf16.msra.mxu0 %v3970_v45 }
  0x29   :  { %3561 = vmatprep.subr.bf16.mxu0 %v4095_v2 }
  0x7c   :  { %v104_v46 = vpop.permute.xlu1 %103  ;;  %v102_v47 = vpop.permute.xlu0 %101 }
  0x7d   :  { %v110_v49 = vrot.slane %v104_v46, 4  ;;  %v109_v51 = vrot.slane %v102_v47, 4 }
  0x7f   :  { %v115_v52 = vsel %vm113_vm8, %v110_v49, %v104_v46  ;;  %v114_v53 = vsel %vm113_vm8, %v109_v51, %v102_v47  ;;  %v3955_v49 = vld [vmem:[%s5122_s1 + $0xd8] sm:$0xff]  }
  0x80   :  { %v136_v54 = vsel %vm4226_vm12, %v115_v52, %v135_v48  ;;  %v128_v55 = vsel %vm4242_vm5, %v114_v53, %v127_v50  ;;  %v108_v56 = vpop.permute.xlu1 %107  ;;  %v106_v57 = vpop.permute.xlu0 %105 }
  0x81   :  { %137 = vst [vmem:[#allocation2 + $0x8] sm:$0x11] %v136_v54  ;;  %129 = vst [vmem:[#allocation2] sm:$0xff] %v128_v55  ;;  %v112_v59 = vrot.slane %v108_v56, 4  ;;  %v111_v61 = vrot.slane %v106_v57, 4  ;;  %v647_v0 = vshrl.u32 %v128_v55, 16 }
  0x82   :  { %v650_v1 = vshll.u32 %v128_v55, 16 }
  0x83   :  { %v117_v62 = vsel %vm113_vm8, %v112_v59, %v108_v56  ;;  %v116_v63 = vsel %vm113_vm8, %v111_v61, %v106_v57  ;;  %v649_v9 = vrot.slane %v647_v0, 4 }
  0x84   :  { %v142_v3 = vsel %vm4226_vm12, %v117_v62, %v141_v58  ;;  %v139_v4 = vsel %vm4242_vm5, %v116_v63, %v138_v60  ;;  %v652_v10 = vrot.slane %v650_v1, 5  ;;  %v3957_v62 = vld [vmem:[%s5122_s1 + $0xc8] sm:$0xff]  }
  0x85   :  { %143 = vst [vmem:[#allocation2 + $0x18] sm:$0x11] %v142_v3  ;;  %140 = vst [vmem:[#allocation2 + $0x10] sm:$0xff] %v139_v4  ;;  %v2910_v5 = vcombine.high %v128_v55, %v139_v4  ;;  %v2909_v6 = vcombine.low %v128_v55, %v139_v4  ;;  %v661_v7 = vshrl.u32 %v139_v4, 16  ;;  %v664_v8 = vshll.u32 %v139_v4, 16  ;;  %v3956_v55 = vld [vmem:[%s5122_s1 + $0xd0] sm:$0xff]  }
  0x86   :  { %v653_v16 = vor.u32 %v652_v10, %v649_v9  ;;  %v3958_v4 = vld [vmem:[%s5122_s1 + $0xc0] sm:$0xff]   ;;  %v3963_v9 = vld [vmem:[%s5122_s1 + $0x178] sm:$0xff]  }
  0x87   :  { %191 = vrot.lane.b32.xlu1 %v2910_v5, %s4099_s17  ;;  %189 = vrot.lane.b32.xlu0 %v2909_v6, %s4099_s17  ;;  %v663_v11 = vrot.slane %v661_v7, 4  ;;  %v666_v13 = vrot.slane %v664_v8, 5 }
  0x88   :  { %v643_v12 = vld [vmem:[#allocation2 + $0x8] sm:$0x11]  ;;  %v654_v24 = vrot.slane %v653_v16, 4  ;;  %v1037_v33 = vld [vmem:[#allocation2] sm:$0xee] }
  0x89   :  { %v656_v14 = vshll.u32 %v643_v12, 16  ;;  %v667_v17 = vor.u32 %v666_v13, %v663_v11  ;;  %v3054_v38 = vrot.slane %v1037_v33, 9  ;;  %v1045_v39 = vrot.slane %v643_v12, 5  ;;  %v495_v44 = vld [vmem:[#allocation2] sm:$0xf]  ;;  %v3965_v11 = vld [vmem:[%s5122_s1 + $0x170] sm:$0xff]  }
  0x8a   :  { %v503_v51 = vshrl.u32 %v495_v44, 16  ;;  %v506_v52 = vshll.u32 %v495_v44, 16  ;;  %v4360_v61 = vld [vmem:[#allocation2 + $0x8] sm:$0x1]  ;;  %v3969_v13 = vld [vmem:[%s5122_s1 + $0x160] sm:$0xff]   ;;  %v3979_v33 = vld [vmem:[%s5122_s1 + $0x1f8] sm:$0xff]  }
  0x8b   :  { %399 = vrot.lane.b32.xlu1 %v2910_v5, %s4100_s20  ;;  %397 = vrot.lane.b32.xlu0 %v2909_v6, %s4100_s20  ;;  %v658_v20 = vrot.slane %v656_v14, 5  ;;  %v668_v25 = vrot.slane %v667_v17, 4  ;;  %v1046_v45 = vsel %vm4331_vm4, %v3054_v38, %v1045_v39  ;;  %v512_v0 = vshll.u32 %v4360_v61, 16  ;;  %v3967_v12 = vld [vmem:[%s5122_s1 + $0x168] sm:$0xff]   ;;  %v3971_v14 = vld [vmem:[%s5122_s1 + $0x158] sm:$0xff]  }
  0x8c   :  { %v3950_v18 = vld [vmem:[#allocation2] ss:$16 sps:$4 sm:$0xff]   ;;  %v645_v19 = vld [vmem:[#allocation2 + $0x18] sm:$0x11]  ;;  %v505_v56 = vrot.slane %v503_v51, 4  ;;  %v508_v57 = vrot.slane %v506_v52, 5 }
  0x8d   :  { %v670_v21 = vshll.u32 %v645_v19, 16  ;;  %3558 = vmatmul.mubr.bf16.vlgmr.msra.gmra.mxu1 %v3950_v18  ;;  %v1038_v27 = vld [vmem:[#allocation2 + $0x10] sm:$0xee]  ;;  %v659_v28 = vsel %vm4311_vm14, %v654_v24, %v658_v20  ;;  %v1049_v37 = vrot.slane %v645_v19, 5  ;;  %v4356_v58 = vld [vmem:[#allocation2 + $0x18] sm:$0x1] }
  0x8e   :  { %3582 = vmatpush3.bf16.msra.mxu1 %v3951_v15  ;;  %3597 = vmatprep.mubr.msk.bf16.mxu1 %vm4098_vm10, %v4095_v2  ;;  %v3055_v36 = vrot.slane %v1038_v27, 9  ;;  %v497_v41 = vld [vmem:[#allocation2 + $0x10] sm:$0xf]  ;;  %v526_v60 = vshll.u32 %v4356_v58, 16  ;;  %v509_v63 = vor.u32 %v508_v57, %v505_v56  ;;  %v514_v6 = vrot.slane %v512_v0, 5  ;;  %v3975_v16 = vld [vmem:[%s5122_s1 + $0x148] sm:$0xff]  }
  0x8f   :  { %v672_v26 = vrot.slane %v670_v21, 5  ;;  %3583 = vmatprep.subr.bf16.mxu1 %v4095_v2  ;;  %v517_v46 = vshrl.u32 %v497_v41, 16  ;;  %v520_v47 = vshll.u32 %v497_v41, 16  ;;  %v3973_v15 = vld [vmem:[%s5122_s1 + $0x150] sm:$0xff]   ;;  %v3977_v17 = vld [vmem:[%s5122_s1 + $0x140] sm:$0xff]   ;;  %v3972_v18 = vld [vmem:[%s5122_s1 + $0xb8] sm:$0xff]  }
  0x90   :  { %v1050_v43 = vsel %vm4331_vm4, %v3055_v36, %v1049_v37  ;;  %v528_v3 = vrot.slane %v526_v60, 5  ;;  %v510_v5 = vrot.slane %v509_v63, 4  ;;  %v3976_v24 = vld [vmem:[%s5122_s1 + $0xa8] sm:$0xff]   ;;  %v3978_v27 = vld [vmem:[%s5122_s1 + $0xa0] sm:$0xff]   ;;  %v3982_v37 = vld [vmem:[%s5122_s1 + $0x90] sm:$0xff]  }
  0x91   :  { %v673_v29 = vsel %vm4311_vm14, %v668_v25, %v672_v26  ;;  %v3073_v48 = vcombine.high %v1046_v45, %v1050_v43  ;;  %v3072_v50 = vcombine.low %v1046_v45, %v1050_v43  ;;  %v519_v53 = vrot.slane %v517_v46, 4  ;;  %v3981_v38 = vld [vmem:[%s5122_s1 + $0x1f0] sm:$0xff]   ;;  %v3984_v39 = vld [vmem:[%s5122_s1 + $0x88] sm:$0xff]   ;;  %v3985_v43 = vld [vmem:[%s5122_s1 + $0x1e0] sm:$0xff]  }
  0x92   :  { %v2994_v30 = vcombine.high %v659_v28, %v673_v29  ;;  %v2993_v31 = vcombine.low %v659_v28, %v673_v29  ;;  %3584 = vmatpush3.bf16.msra.mxu1 %v3952_v23  ;;  %v522_v54 = vrot.slane %v520_v47, 5  ;;  %v515_v8 = vsel %vm4311_vm14, %v510_v5, %v514_v6  ;;  %v3974_v23 = vld [vmem:[%s5122_s1 + $0xb0] sm:$0xff]   ;;  %v3983_v41 = vld [vmem:[%s5122_s1 + $0x1e8] sm:$0xff]   ;;  %v3988_v44 = vld [vmem:[%s5122_s1 + $0x138] sm:$0xff]  }
  0x93   :  { %3585 = vmatprep.subr.bf16.mxu1 %v4095_v2  ;;  %v3987_v46 = vld [vmem:[%s5122_s1 + $0x1d8] sm:$0xff]   ;;  %v3990_v47 = vld [vmem:[%s5122_s1 + $0x130] sm:$0xff]   ;;  %v3994_v51 = vld [vmem:[%s5122_s1 + $0x120] sm:$0xff]  }
  0x94   :  { %699 = vrot.lane.b32.xlu1 %v2994_v30, %s4099_s17  ;;  %697 = vrot.lane.b32.xlu0 %v2993_v31, %s4099_s17  ;;  %v523_v59 = vor.u32 %v522_v54, %v519_v53  ;;  %v3993_v52 = vld [vmem:[%s5122_s1 + $0x1c0] sm:$0xff]   ;;  %v3995_v53 = vld [vmem:[%s5122_s1 + $0x118] sm:$0xff]  }
  0x95   :  { %v3996_v57 = vld [vmem:[%s5122_s1 + $0x110] sm:$0xff]   ;;  %v3998_v60 = vld [vmem:[%s5122_s1 + $0x100] sm:$0xff]  }
  0x96   :  { %3586 = vmatpush3.bf16.msra.mxu1 %v3953_v35  ;;  %v524_v1 = vrot.slane %v523_v59, 4  ;;  %v3997_v59 = vld [vmem:[%s5122_s1 + $0x108] sm:$0xff]   ;;  %v4000_v0 = vld [vmem:[%s5122_s1 + $0x1b0] sm:$0xff]  }
  0x97   :  { %3587 = vmatprep.subr.bf16.mxu1 %v4095_v2  ;;  %v4004_v5 = vld [vmem:[%s5122_s1 + $0x190] sm:$0xff]  }
  0x98   :  { %813 = vrot.lane.b32.xlu1 %v2994_v30, %s4100_s20  ;;  %811 = vrot.lane.b32.xlu0 %v2993_v31, %s4100_s20  ;;  %v529_v7 = vsel %vm4311_vm14, %v524_v1, %v528_v3  ;;  %v3980_v30 = vld [vmem:[%s5122_s1 + $0x98] sm:$0xff]   ;;  %v4001_v1 = vld [vmem:[%s5122_s1 + $0x1a8] sm:$0xff]  }
  0x99   :  { %v2968_v10 = vcombine.low %v515_v8, %v529_v7  ;;  %v4002_v3 = vld [vmem:[%s5122_s1 + $0x1a0] sm:$0xff]   ;;  %v909_v7 = vld [vmem:[#allocation2 + $0x10] sm:$0xe] }
  0x9a   :  { %3588 = vmatpush3.bf16.msra.mxu1 %v3954_v42  ;;  %v3986_v42 = vld [vmem:[%s5122_s1 + $0x80] sm:$0xff]  }
  0x9b   :  { %3589 = vmatprep.subr.bf16.mxu1 %v4095_v2 }
  0x9c   :  { %1076 = vrot.lane.b32.xlu1 %v3073_v48, %s4099_s17  ;;  %1074 = vrot.lane.b32.xlu0 %v3072_v50, %s4099_s17 }
  0x9e   :  { %3590 = vmatpush3.bf16.msra.mxu1 %v3955_v49  ;;  %v3992_v49 = vld [vmem:[%s5122_s1 + $0x128] sm:$0xff]  }
  0x9f   :  { %3591 = vmatprep.subr.bf16.mxu1 %v4095_v2 }
  0xa0   :  { %1190 = vrot.lane.b32.xlu1 %v3073_v48, %s4100_s20  ;;  %1188 = vrot.lane.b32.xlu0 %v3072_v50, %s4100_s20  ;;  %v3989_v48 = vld [vmem:[%s5122_s1 + $0x1d0] sm:$0xff]   ;;  %v3991_v50 = vld [vmem:[%s5122_s1 + $0x1c8] sm:$0xff]  }
  0xa2   :  { %3592 = vmatpush3.bf16.msra.mxu1 %v3956_v55 }
  0xa3   :  { %3593 = vmatprep.subr.bf16.mxu1 %v4095_v2 }
  0xa6   :  { %3594 = vmatpush3.bf16.msra.mxu1 %v3957_v62  ;;  %v3999_v62 = vld [vmem:[%s5122_s1 + $0x1b8] sm:$0xff]  }
  0xa7   :  { %3595 = vmatprep.subr.bf16.mxu1 %v4095_v2 }
  0xaa   :  { %3596 = vmatpush3.bf16.msra.mxu1 %v3958_v4  ;;  %v4003_v4 = vld [vmem:[%s5122_s1 + $0x198] sm:$0xff]  }
  0xab   :  { %3621 = vmatprep.subr.bf16.mxu1 %v4095_v2 }
  0xad   :  { %3598 = vmatmul.mubr.bf16.vlgmr.msra.gmra.mxu1 %v2968_v10  ;;  %v908_v10 = vld [vmem:[#allocation2] sm:$0xe] }
  0xae   :  { %3622 = vmatpush3.bf16.msra.mxu1 %v3963_v9  ;;  %3637 = vmatprep.mubr.msk.bf16.mxu1 %vm4098_vm10, %v4095_v2  ;;  %v4005_v9 = vld [vmem:[%s5122_s1 + $0x188] sm:$0xff]  }
  0xaf   :  { %3623 = vmatprep.subr.bf16.mxu1 %v4095_v2 }
  0xb2   :  { %3624 = vmatpush3.bf16.msra.mxu1 %v3965_v11 }
  0xb3   :  { %3625 = vmatprep.subr.bf16.mxu1 %v4095_v2 }
  0xb6   :  { %3626 = vmatpush3.bf16.msra.mxu1 %v3967_v12  ;;  %v3028_v12 = vrot.slane %v909_v7, 9 }
  0xb7   :  { %3627 = vmatprep.subr.bf16.mxu1 %v4095_v2 }
  0xba   :  { %3628 = vmatpush3.bf16.msra.mxu1 %v3969_v13  ;;  %v923_v13 = vrot.slane %v4356_v58, 5  ;;  %v4007_v58 = vld [vmem:[%s5122_s1 + $0x238] sm:$0xff]  }
  0xbb   :  { %3629 = vmatprep.subr.bf16.mxu1 %v4095_v2 }
  0xbe   :  { %3630 = vmatpush3.bf16.msra.mxu1 %v3971_v14 }
  0xbf   :  { %3631 = vmatprep.subr.bf16.mxu1 %v4095_v2 }
  0xc2   :  { %3632 = vmatpush3.bf16.msra.mxu1 %v3973_v15  ;;  %v4006_v15 = vld [vmem:[%s5122_s1 + $0x180] sm:$0xff]  }
  0xc3   :  { %3633 = vmatprep.subr.bf16.mxu1 %v4095_v2 }
  0xc6   :  { %3634 = vmatpush3.bf16.msra.mxu1 %v3975_v16  ;;  %v3027_v16 = vrot.slane %v908_v10, 9 }
  0xc7   :  { %3635 = vmatprep.subr.bf16.mxu1 %v4095_v2 }
  0xca   :  { %3636 = vmatpush3.bf16.msra.mxu1 %v3977_v17  ;;  %v919_v17 = vrot.slane %v4360_v61, 5  ;;  %v4008_v61 = vld [vmem:[%s5122_s1 + $0x230] sm:$0xff]  }
  0xcb   :  { %3661 = vmatprep.subr.bf16.mxu1 %v4095_v2 }
  0xf9   :  { %v192_v19 = vpop.permute.xlu1 %191  ;;  %v190_v20 = vpop.permute.xlu0 %189 }
  0xfa   :  { %v194_v21 = vsel %vm193_vm2, %v190_v20, %v192_v19  ;;  %v920_v19 = vsel %vm4331_vm4, %v3027_v16, %v919_v17 }
  0xfb   :  { %3538 = vmatmul.mubr.bf16.vlgmr.msra.gmra.mxu0 %v194_v21  ;;  %v4009_v21 = vld [vmem:[%s5122_s1 + $0x228] sm:$0xff]  }
  0xfc   :  { %3562 = vmatpush3.bf16.msra.mxu0 %v3972_v18  ;;  %3577 = vmatprep.mubr.msk.bf16.mxu0 %vm4098_vm10, %v4095_v2  ;;  %v924_v18 = vsel %vm4331_vm4, %v3028_v12, %v923_v13 }
  0xfd   :  { %3563 = vmatprep.subr.bf16.mxu0 %v4095_v2  ;;  %v400_v25 = vpop.permute.xlu1 %399  ;;  %v398_v26 = vpop.permute.xlu0 %397  ;;  %v3045_v20 = vcombine.low %v920_v19, %v924_v18 }
  0xfe   :  { %v402_v45 = vsel %vm401_vm6, %v398_v26, %v400_v25  ;;  %v4012_v25 = vld [vmem:[%s5122_s1 + $0x210] sm:$0xff]  }
 0x100   :  { %3564 = vmatpush3.bf16.msra.mxu0 %v3974_v23  ;;  %v4010_v23 = vld [vmem:[%s5122_s1 + $0x220] sm:$0xff]  }
 0x101   :  { %3565 = vmatprep.subr.bf16.mxu0 %v4095_v2 }
 0x104   :  { %3566 = vmatpush3.bf16.msra.mxu0 %v3976_v24  ;;  %v4011_v24 = vld [vmem:[%s5122_s1 + $0x218] sm:$0xff]  }
 0x105   :  { %3567 = vmatprep.subr.bf16.mxu0 %v4095_v2 }
 0x106   :  { %v4428_v28 = vpop.permute.xlu1 %699  ;;  %v4430_v29 = vpop.permute.xlu0 %697 }
 0x107   :  { %v701_v63 = vsel %vm193_vm2, %v4430_v29, %v4428_v28  ;;  %v4013_v28 = vld [vmem:[%s5122_s1 + $0x208] sm:$0xff]  }
 0x108   :  { %3568 = vmatpush3.bf16.msra.mxu0 %v3978_v27 }
 0x109   :  { %3569 = vmatprep.subr.bf16.mxu0 %v4095_v2 }
 0x10a   :  { %v814_v31 = vpop.permute.xlu1 %813  ;;  %v812_v35 = vpop.permute.xlu0 %811 }
 0x10b   :  { %v815_v36 = vsel %vm401_vm6, %v812_v35, %v814_v31  ;;  %v4014_v31 = vld [vmem:[%s5122_s1 + $0x200] sm:$0xff]  }
 0x10c   :  { %3570 = vmatpush3.bf16.msra.mxu0 %v3980_v30  ;;  %3638 = vmatmul.mubr.bf16.vlgmr.msra.gmra.mxu1 %v815_v36 }
 0x10d   :  { %3571 = vmatprep.subr.bf16.mxu0 %v4095_v2  ;;  %3662 = vmatpush3.bf16.msra.mxu1 %v3979_v33 }
 0x10e   :  { %3677 = vmatprep.mubr.msk.bf16.mxu1 %vm4098_vm10, %v4095_v2  ;;  %3663 = vmatprep.subr.bf16.mxu1 %v4095_v2  ;;  %v1077_v54 = vpop.permute.xlu1 %1076  ;;  %v1075_v55 = vpop.permute.xlu0 %1074 }
 0x10f   :  { %v1078_v56 = vsel %vm193_vm2, %v1075_v55, %v1077_v54 }
 0x110   :  { %3572 = vmatpush3.bf16.msra.mxu0 %v3982_v37 }
 0x111   :  { %3573 = vmatprep.subr.bf16.mxu0 %v4095_v2  ;;  %3664 = vmatpush3.bf16.msra.mxu1 %v3981_v38 }
 0x112   :  { %3665 = vmatprep.subr.bf16.mxu1 %v4095_v2  ;;  %v1191_v33 = vpop.permute.xlu1 %1190  ;;  %v1189_v35 = vpop.permute.xlu0 %1188 }
 0x113   :  { %v1192_v36 = vsel %vm401_vm6, %v1189_v35, %v1191_v33  ;;  %v4020_v33 = vld [vmem:[%s5123_s3 + $0x10] sm:$0xff]  }
 0x114   :  { %3574 = vmatpush3.bf16.msra.mxu0 %v3984_v39 }
 0x115   :  { %3575 = vmatprep.subr.bf16.mxu0 %v4095_v2  ;;  %3666 = vmatpush3.bf16.msra.mxu1 %v3983_v41 }
 0x116   :  { %3667 = vmatprep.subr.bf16.mxu1 %v4095_v2 }
 0x118   :  { %3576 = vmatpush3.bf16.msra.mxu0 %v3986_v42 }
 0x119   :  { %3601 = vmatprep.subr.bf16.mxu0 %v4095_v2  ;;  %3668 = vmatpush3.bf16.msra.mxu1 %v3985_v43 }
 0x11a   :  { %3669 = vmatprep.subr.bf16.mxu1 %v4095_v2 }
 0x11b   :  { %3578 = vmatmul.mubr.bf16.vlgmr.msra.gmra.mxu0 %v402_v45 }
 0x11c   :  { %3602 = vmatpush3.bf16.msra.mxu0 %v3988_v44  ;;  %3617 = vmatprep.mubr.msk.bf16.mxu0 %vm4098_vm10, %v4095_v2 }
 0x11d   :  { %3603 = vmatprep.subr.bf16.mxu0 %v4095_v2  ;;  %3670 = vmatpush3.bf16.msra.mxu1 %v3987_v46  ;;  %v4015_v46 = vld [vmem:[%s5123_s3 + $0x38] sm:$0xff]  }
 0x11e   :  { %3671 = vmatprep.subr.bf16.mxu1 %v4095_v2 }
 0x120   :  { %3604 = vmatpush3.bf16.msra.mxu0 %v3990_v47  ;;  %v4016_v47 = vld [vmem:[%s5123_s3 + $0x30] sm:$0xff]  }
 0x121   :  { %3605 = vmatprep.subr.bf16.mxu0 %v4095_v2  ;;  %3672 = vmatpush3.bf16.msra.mxu1 %v3989_v48  ;;  %v4017_v48 = vld [vmem:[%s5123_s3 + $0x28] sm:$0xff]  }
 0x122   :  { %3673 = vmatprep.subr.bf16.mxu1 %v4095_v2 }
 0x124   :  { %3606 = vmatpush3.bf16.msra.mxu0 %v3992_v49 }
 0x125   :  { %3607 = vmatprep.subr.bf16.mxu0 %v4095_v2  ;;  %3674 = vmatpush3.bf16.msra.mxu1 %v3991_v50 }
 0x126   :  { %3675 = vmatprep.subr.bf16.mxu1 %v4095_v2 }
 0x128   :  { %3608 = vmatpush3.bf16.msra.mxu0 %v3994_v51  ;;  %v4018_v51 = vld [vmem:[%s5123_s3 + $0x20] sm:$0xff]  }
 0x129   :  { %3609 = vmatprep.subr.bf16.mxu0 %v4095_v2  ;;  %3676 = vmatpush3.bf16.msra.mxu1 %v3993_v52 }
 0x12a   :  { %3701 = vmatprep.subr.bf16.mxu1 %v4095_v2 }
 0x12c   :  { %3610 = vmatpush3.bf16.msra.mxu0 %v3995_v53  ;;  %3678 = vmatmul.mubr.bf16.vlgmr.msra.gmra.mxu1 %v1078_v56 }
 0x12d   :  { %3611 = vmatprep.subr.bf16.mxu0 %v4095_v2  ;;  %3717 = vmatprep.mubr.msk.bf16.mxu1 %vm4098_vm10, %v4095_v2 }
 0x130   :  { %3612 = vmatpush3.bf16.msra.mxu0 %v3996_v57 }
 0x131   :  { %3613 = vmatprep.subr.bf16.mxu0 %v4095_v2 }
 0x134   :  { %3614 = vmatpush3.bf16.msra.mxu0 %v3997_v59 }
 0x135   :  { %3615 = vmatprep.subr.bf16.mxu0 %v4095_v2 }
 0x138   :  { %3616 = vmatpush3.bf16.msra.mxu0 %v3998_v60 }
 0x139   :  { %3641 = vmatprep.subr.bf16.mxu0 %v4095_v2 }
 0x13b   :  { %3618 = vmatmul.mubr.bf16.vlgmr.msra.gmra.mxu0 %v701_v63 }
 0x13c   :  { %3642 = vmatpush3.bf16.msra.mxu0 %v3999_v62  ;;  %3657 = vmatprep.mubr.msk.bf16.mxu0 %vm4098_vm10, %v4095_v2 }
 0x13d   :  { %3643 = vmatprep.subr.bf16.mxu0 %v4095_v2 }
 0x140   :  { %3644 = vmatpush3.bf16.msra.mxu0 %v4000_v0 }
 0x141   :  { %3645 = vmatprep.subr.bf16.mxu0 %v4095_v2 }
 0x144   :  { %3646 = vmatpush3.bf16.msra.mxu0 %v4001_v1 }
 0x145   :  { %3647 = vmatprep.subr.bf16.mxu0 %v4095_v2 }
 0x148   :  { %3648 = vmatpush3.bf16.msra.mxu0 %v4002_v3 }
 0x149   :  { %3649 = vmatprep.subr.bf16.mxu0 %v4095_v2 }
 0x14c   :  { %3650 = vmatpush3.bf16.msra.mxu0 %v4003_v4 }
 0x14d   :  { %3651 = vmatprep.subr.bf16.mxu0 %v4095_v2  ;;  %v4550_v6 = vpop.f32.mrf.mxu1 }
 0x14f   :  { %v3559_v8 = vpop.f32.mrf.mxu1 }
 0x150   :  { %3652 = vmatpush3.bf16.msra.mxu0 %v4004_v5 }
 0x151   :  { %3653 = vmatprep.subr.bf16.mxu0 %v4095_v2  ;;  %v4556_v11 = vpop.f32.mrf.mxu1 }
 0x153   :  { %v3560_v14 = vpop.f32.mrf.mxu1 }
 0x154   :  { %3654 = vmatpush3.bf16.msra.mxu0 %v4005_v9 }
 0x155   :  { %3655 = vmatprep.subr.bf16.mxu0 %v4095_v2 }
 0x158   :  { %3656 = vmatpush3.bf16.msra.mxu0 %v4006_v15 }
 0x159   :  { %3681 = vmatprep.subr.bf16.mxu0 %v4095_v2 }
 0x15b   :  { %3658 = vmatmul.mubr.bf16.vlgmr.msra.gmra.mxu0 %v3045_v20 }
 0x15c   :  { %3682 = vmatpush3.bf16.msra.mxu0 %v4007_v58  ;;  %3697 = vmatprep.mubr.msk.bf16.mxu0 %vm4098_vm10, %v4095_v2  ;;  %v3106_v58 = vld [vmem:[%s5124_s2] ss:$0 sm:$0xff] }
 0x15d   :  { %3683 = vmatprep.subr.bf16.mxu0 %v4095_v2 }
 0x160   :  { %3684 = vmatpush3.bf16.msra.mxu0 %v4008_v61 }
 0x161   :  { %3685 = vmatprep.subr.bf16.mxu0 %v4095_v2 }
 0x164   :  { %3686 = vmatpush3.bf16.msra.mxu0 %v4009_v21 }
 0x165   :  { %3687 = vmatprep.subr.bf16.mxu0 %v4095_v2 }
 0x168   :  { %3688 = vmatpush3.bf16.msra.mxu0 %v4010_v23 }
 0x169   :  { %3689 = vmatprep.subr.bf16.mxu0 %v4095_v2 }
 0x16c   :  { %3690 = vmatpush3.bf16.msra.mxu0 %v4011_v24 }
 0x16d   :  { %3691 = vmatprep.subr.bf16.mxu0 %v4095_v2  ;;  %v633_v26 = vpop.f32.mrf.mxu1 }
 0x16f   :  { %v3599_v27 = vpop.f32.mrf.mxu1 }
 0x170   :  { %3692 = vmatpush3.bf16.msra.mxu0 %v4012_v25  ;;  %v4019_v27 = vld [vmem:[%s5123_s3 + $0x18] sm:$0xff]  }
 0x171   :  { %3693 = vmatprep.subr.bf16.mxu0 %v4095_v2  ;;  %v636_v29 = vpop.f32.mrf.mxu1 }
 0x173   :  { %v3600_v30 = vpop.f32.mrf.mxu1 }
 0x174   :  { %3694 = vmatpush3.bf16.msra.mxu0 %v4013_v28 }
 0x175   :  { %3695 = vmatprep.subr.bf16.mxu0 %v4095_v2 }
 0x178   :  { %3696 = vmatpush3.bf16.msra.mxu0 %v4014_v31 }
 0x179   :  { %3721 = vmatprep.subr.bf16.mxu0 %v4095_v2 }
 0x17b   :  { %3698 = vmatmul.mubr.bf16.vlgmr.msra.gmra.mxu0 %v1192_v36 }
 0x17c   :  { %3737 = vmatprep.mubr.msk.bf16.mxu0 %vm4098_vm10, %v4095_v2  ;;  %3722 = vmatpush3.bf16.msra.mxu0 %v4015_v46 }
 0x17d   :  { %3723 = vmatprep.subr.bf16.mxu0 %v4095_v2 }
 0x180   :  { %3724 = vmatpush3.bf16.msra.mxu0 %v4016_v47 }
 0x181   :  { %3725 = vmatprep.subr.bf16.mxu0 %v4095_v2 }
 0x184   :  { %3726 = vmatpush3.bf16.msra.mxu0 %v4017_v48  ;;  %v4032_v48 = vld [vmem:[%s5123_s3 + $0x78] sm:$0xff]  }
 0x185   :  { %3727 = vmatprep.subr.bf16.mxu0 %v4095_v2  ;;  %3702 = vmatpush3.bf16.msra.mxu1 %v4032_v48 }
 0x186   :  { %3703 = vmatprep.subr.bf16.mxu1 %v4095_v2 }
 0x188   :  { %3728 = vmatpush3.bf16.msra.mxu0 %v4018_v51  ;;  %v4035_v51 = vld [vmem:[%s5123_s3 + $0x60] sm:$0xff]  }
 0x189   :  { %3729 = vmatprep.subr.bf16.mxu0 %v4095_v2 }
 0x18c   :  { %3730 = vmatpush3.bf16.msra.mxu0 %v4019_v27 }
 0x18d   :  { %3731 = vmatprep.subr.bf16.mxu0 %v4095_v2 }
 0x190   :  { %3732 = vmatpush3.bf16.msra.mxu0 %v4020_v33 }
 0x191   :  { %3733 = vmatprep.subr.bf16.mxu0 %v4095_v2 }
 0x1bb   :  { %v278_v37 = vpop.f32.mrf.mxu0 }
 0x1bc   :  { %v374_v49 = vadd.f32 %v4550_v6, %v278_v37 }
 0x1bd   :  { %v3539_v38 = vpop.f32.mrf.mxu0 }
 0x1bf   :  { %v281_v39 = vpop.f32.mrf.mxu0 }
 0x1c0   :  { %v377_v54 = vadd.f32 %v4556_v11, %v281_v39 }
 0x1c1   :  { %v3540_v41 = vpop.f32.mrf.mxu0 }
 0x1c2   :  { %v4021_v41 = vld [vmem:[%s5123_s3 + $0x8] sm:$0xff]  }
 0x1c3   :  { %3734 = vmatpush3.bf16.msra.mxu0 %v4021_v41 }
 0x1c4   :  { %3735 = vmatprep.subr.bf16.mxu0 %v4095_v2 }
 0x1cc   :  { %v899_v42 = vpop.f32.mrf.mxu1 }
 0x1ce   :  { %v3639_v43 = vpop.f32.mrf.mxu1 }
 0x1d0   :  { %v902_v44 = vpop.f32.mrf.mxu1 }
 0x1d2   :  { %v3640_v45 = vpop.f32.mrf.mxu1 }
 0x1db   :  { %v486_v50 = vpop.f32.mrf.mxu0 }
 0x1dc   :  { %v493_v52 = vadd.f32 %v486_v50, %v374_v49  ;;  %v4033_v49 = vld [vmem:[%s5123_s3 + $0x70] sm:$0xff]   ;;  %v4034_v50 = vld [vmem:[%s5123_s3 + $0x68] sm:$0xff]  }
 0x1dd   :  { %v3579_v53 = vpop.f32.mrf.mxu0  ;;  %3704 = vmatpush3.bf16.msra.mxu1 %v4033_v49 }
 0x1de   :  { %v640_v0 = vadd.f32 %v633_v26, %v493_v52  ;;  %3705 = vmatprep.subr.bf16.mxu1 %v4095_v2  ;;  %v4037_v52 = vld [vmem:[%s5123_s3 + $0x58] sm:$0xff]   ;;  %v4039_v53 = vld [vmem:[%s5123_s3 + $0x50] sm:$0xff]  }
 0x1df   :  { %v489_v55 = vpop.f32.mrf.mxu0 }
 0x1e0   :  { %v494_v56 = vadd.f32 %v489_v55, %v377_v54  ;;  %v4041_v54 = vld [vmem:[%s5123_s3 + $0x48] sm:$0xff]   ;;  %v4043_v55 = vld [vmem:[%s5123_s3 + $0x40] sm:$0xff]  }
 0x1e1   :  { %v3580_v57 = vpop.f32.mrf.mxu0  ;;  %3706 = vmatpush3.bf16.msra.mxu1 %v4034_v50 }
 0x1e2   :  { %v641_v5 = vadd.f32 %v636_v29, %v494_v56  ;;  %3707 = vmatprep.subr.bf16.mxu1 %v4095_v2 }
 0x1e5   :  { %3708 = vmatpush3.bf16.msra.mxu1 %v4035_v51 }
 0x1e6   :  { %3709 = vmatprep.subr.bf16.mxu1 %v4095_v2 }
 0x1e9   :  { %3710 = vmatpush3.bf16.msra.mxu1 %v4037_v52 }
 0x1ea   :  { %3711 = vmatprep.subr.bf16.mxu1 %v4095_v2 }
 0x1ec   :  { %v1162_v59 = vpop.f32.mrf.mxu1 }
 0x1ed   :  { %3712 = vmatpush3.bf16.msra.mxu1 %v4039_v53  ;;  %v4027_v53 = vld [vmem:[%s5123_s3 + $0xe0] sm:$0xff]  }
 0x1ee   :  { %v3679_v60 = vpop.f32.mrf.mxu1  ;;  %3713 = vmatprep.subr.bf16.mxu1 %v4095_v2 }
 0x1ef   :  { %v4092_v60 = vld [vmem:[#allocation2] sm:$0xff] }
 0x1f0   :  { %v1165_v62 = vpop.f32.mrf.mxu1 }
 0x1f1   :  { %3714 = vmatpush3.bf16.msra.mxu1 %v4041_v54 }
 0x1f2   :  { %v3680_v63 = vpop.f32.mrf.mxu1  ;;  %3715 = vmatprep.subr.bf16.mxu1 %v4095_v2 }
 0x1f5   :  { %3716 = vmatpush3.bf16.msra.mxu1 %v4043_v55 }
 0x1f6   :  { %3741 = vmatprep.subr.bf16.mxu1 %v4095_v2 }
 0x1fb   :  { %v785_v1 = vpop.f32.mrf.mxu0 }
 0x1fc   :  { %v792_v3 = vadd.f32 %v785_v1, %v640_v0 }
 0x1fd   :  { %v3619_v4 = vpop.f32.mrf.mxu0 }
 0x1fe   :  { %v906_v6 = vadd.f32 %v899_v42, %v792_v3  ;;  %v1342_v4 = vld [vmem:[#allocation2 + $0x8] sm:$0x11] }
 0x1ff   :  { %v788_v7 = vpop.f32.mrf.mxu0 }
 0x200   :  { %v793_v8 = vadd.f32 %v788_v7, %v641_v5 }
 0x201   :  { %v3620_v9 = vpop.f32.mrf.mxu0 }
 0x202   :  { %v907_v10 = vadd.f32 %v902_v44, %v793_v8  ;;  %v4022_v44 = vld [vmem:[%s5123_s3] sm:$0xff]  }
 0x203   :  { %3736 = vmatpush3.bf16.msra.mxu0 %v4022_v44 }
 0x204   :  { %3761 = vmatprep.subr.bf16.mxu0 %v4095_v2 }
 0x21b   :  { %v1028_v11 = vpop.f32.mrf.mxu0 }
 0x21c   :  { %v1035_v12 = vadd.f32 %v1028_v11, %v906_v6  ;;  %v1345_v6 = vld [vmem:[#allocation2 + $0x10] sm:$0xff] }
 0x21d   :  { %v3659_v13 = vpop.f32.mrf.mxu0 }
 0x21e   :  { %v1169_v14 = vadd.f32 %v1162_v59, %v1035_v12 }
 0x21f   :  { %v1031_v15 = vpop.f32.mrf.mxu0 }
 0x220   :  { %v1036_v16 = vadd.f32 %v1031_v15, %v907_v10  ;;  %v1348_v15 = vld [vmem:[#allocation2 + $0x18] sm:$0x11] }
 0x221   :  { %v3660_v17 = vpop.f32.mrf.mxu0 }
 0x222   :  { %v1170_v18 = vadd.f32 %v1165_v62, %v1036_v16 }
 0x23b   :  { %v1276_v19 = vpop.f32.mrf.mxu0 }
 0x23c   :  { %v1283_v20 = vadd.f32 %v1276_v19, %v1169_v14 }
 0x23d   :  { %v3699_v61 = vpop.f32.mrf.mxu0 }
 0x23e   :  { %v1292_v21 = vadd.f32 %v3106_v58, %v1283_v20 }
 0x23f   :  { %v1279_v23 = vpop.f32.mrf.mxu0 }
 0x240   :  { %v1294_v24 = vmax.f32 %v1292_v21, 0.0  ;;  %v1284_v25 = vadd.f32 %v1279_v23, %v1170_v18 }
 0x241   :  { %v3700_v26 = vpop.f32.mrf.mxu0 }
 0x242   :  { %v3332_v28 = vpack.c.bf16 %v1294_v24, %v1294_v24  ;;  %v1293_v29 = vadd.f32 %v3106_v58, %v1284_v25  ;;  %v4024_v58 = vld [vmem:[%s5123_s3 + $0xf8] sm:$0xff]  }
 0x244   :  { %v1305_v30 = vshrl.u32 %v3332_v28, 16  ;;  %v1295_v31 = vmax.f32 %v1293_v29, 0.0  ;;  %v1308_v35 = vshll.u32 %v3332_v28, 16 }
 0x246   :  { %v3333_v36 = vpack.c.bf16 %v1295_v31, %v1295_v31  ;;  %v1307_v37 = vrot.slane %v1305_v30, 7 }
 0x248   :  { %v1313_v38 = vshrl.u32 %v3333_v36, 16  ;;  %v1310_v39 = vor.u32 %v1308_v35, %v1307_v37  ;;  %v1316_v42 = vshll.u32 %v3333_v36, 16  ;;  %v1311_v45 = vrot.slane %v1307_v37, 4 }
 0x24a   :  { %1320 = vrot.lane.b32.xlu0 %v1310_v39, %s4096_s27  ;;  %v1315_v43 = vrot.slane %v1313_v38, 7  ;;  %v4026_v38 = vld [vmem:[%s5123_s3 + $0xe8] sm:$0xff]  }
 0x24c   :  { %v1318_v46 = vor.u32 %v1316_v42, %v1315_v43  ;;  %v1319_v47 = vrot.slane %v1315_v43, 4 }
 0x24e   :  { %1322 = vrot.lane.b32.xlu0 %v1311_v45, %s4096_s27  ;;  %1324 = vrot.lane.b32.xlu1 %v1318_v46, %s4096_s27 }
 0x252   :  { %1326 = vrot.lane.b32.xlu1 %v1319_v47, %s4096_s27 }
 0x2bc   :  { %v1321_v56 = vpop.permute.xlu0 %1320 }
 0x2bd   :  { %v1328_v57 = vrot.slane %v1321_v56, 4 }
 0x2bf   :  { %v1332_v59 = vsel %vm113_vm8, %v1328_v57, %v1321_v56 }
 0x2c0   :  { %v1340_v62 = vsel %vm4242_vm5, %v1332_v59, %v4092_v60  ;;  %v1323_v63 = vpop.permute.xlu0 %1322  ;;  %v1325_v0 = vpop.permute.xlu1 %1324 }
 0x2c1   :  { %1341 = vst [vmem:[#allocation2] sm:$0xff] %v1340_v62  ;;  %v1329_v1 = vrot.slane %v1323_v63, 4  ;;  %v1330_v3 = vrot.slane %v1325_v0, 4  ;;  %v1849_v14 = vshrl.u32 %v1340_v62, 16  ;;  %v1852_v17 = vshll.u32 %v1340_v62, 16 }
 0x2c3   :  { %v1333_v5 = vsel %vm113_vm8, %v1329_v1, %v1323_v63  ;;  %v1334_v7 = vsel %vm113_vm8, %v1330_v3, %v1325_v0  ;;  %v1851_v20 = vrot.slane %v1849_v14, 4  ;;  %v1854_v61 = vrot.slane %v1852_v17, 5  ;;  %v4028_v3 = vld [vmem:[%s5123_s3 + $0xd8] sm:$0xff]   ;;  %v4030_v17 = vld [vmem:[%s5123_s3 + $0xc8] sm:$0xff]  }
 0x2c4   :  { %v1343_v8 = vsel %vm4226_vm12, %v1333_v5, %v1342_v4  ;;  %v1346_v9 = vsel %vm4242_vm5, %v1334_v7, %v1345_v6  ;;  %v1327_v10 = vpop.permute.xlu1 %1326 }
 0x2c5   :  { %1344 = vst [vmem:[#allocation2 + $0x8] sm:$0x11] %v1343_v8  ;;  %1347 = vst [vmem:[#allocation2 + $0x10] sm:$0xff] %v1346_v9  ;;  %v1331_v11 = vrot.slane %v1327_v10, 4  ;;  %v3126_v12 = vcombine.high %v1340_v62, %v1346_v9  ;;  %v3125_v13 = vcombine.low %v1340_v62, %v1346_v9  ;;  %v1863_v18 = vshrl.u32 %v1346_v9, 16 }
 0x2c6   :  { %v1866_v19 = vshll.u32 %v1346_v9, 16  ;;  %v1855_v27 = vor.u32 %v1854_v61, %v1851_v20  ;;  %v4031_v20 = vld [vmem:[%s5123_s3 + $0xc0] sm:$0xff]  }
 0x2c7   :  { %v1335_v16 = vsel %vm113_vm8, %v1331_v11, %v1327_v10  ;;  %1398 = vrot.lane.b32.xlu1 %v3126_v12, %s4099_s17  ;;  %1396 = vrot.lane.b32.xlu0 %v3125_v13, %s4099_s17  ;;  %v1865_v21 = vrot.slane %v1863_v18, 4 }
 0x2c8   :  { %v1349_v34 = vsel %vm4226_vm12, %v1335_v16, %v1348_v15  ;;  %v1868_v23 = vrot.slane %v1866_v19, 5  ;;  %v2110_v35 = vld [vmem:[#allocation2] sm:$0xe]  ;;  %v1856_v39 = vrot.slane %v1855_v27, 4  ;;  %vm2689_vm12 = vcmask 31744  }
 0x2c9   :  { %1350 = vst [vmem:[#allocation2 + $0x18] sm:$0x11] %v1349_v34  ;;  %v3243_v44 = vrot.slane %v2110_v35, 9  ;;  %v2236_v57 = vld [vmem:[#allocation2] sm:$0xee] }
 0x2ca   :  { %v1869_v28 = vor.u32 %v1868_v23, %v1865_v21  ;;  %v1700_v59 = vld [vmem:[#allocation2] sm:$0xf]  ;;  %v3270_v4 = vrot.slane %v2236_v57, 9  ;;  %v4056_v57 = vld [vmem:[%s5123_s3 + $0x1e8] sm:$0xff]  }
 0x2cb   :  { %1605 = vrot.lane.b32.xlu1 %v3126_v12, %s4100_s20  ;;  %1603 = vrot.lane.b32.xlu0 %v3125_v13, %s4100_s20  ;;  %v1705_v6 = vshrl.u32 %v1700_v59, 16  ;;  %v1708_v7 = vshll.u32 %v1700_v59, 16  ;;  %v4029_v13 = vld [vmem:[%s5123_s3 + $0xd0] sm:$0xff]   ;;  %v4042_v27 = vld [vmem:[%s5123_s3 + $0x160] sm:$0xff]  }
 0x2cc   :  { %v4023_v24 = vld [vmem:[#allocation2] ss:$16 sps:$4 sm:$0xff]   ;;  %v1845_v25 = vld [vmem:[#allocation2 + $0x8] sm:$0x11]  ;;  %v1870_v41 = vrot.slane %v1869_v28, 4  ;;  %v4044_v28 = vld [vmem:[%s5123_s3 + $0x158] sm:$0xff]  }
 0x2cd   :  { %v1858_v26 = vshll.u32 %v1845_v25, 16  ;;  %3738 = vmatmul.mubr.bf16.vlgmr.msra.gmra.mxu0 %v4023_v24  ;;  %v4704_v30 = vld [vmem:[#allocation2 + $0x8] sm:$0x1]  ;;  %v2111_v37 = vld [vmem:[#allocation2 + $0x10] sm:$0xe]  ;;  %v2244_v62 = vrot.slane %v1845_v25, 5 }
 0x2ce   :  { %3762 = vmatpush3.bf16.msra.mxu0 %v4024_v58  ;;  %3777 = vmatprep.mubr.msk.bf16.mxu0 %vm4098_vm10, %v4095_v2  ;;  %v2118_v43 = vrot.slane %v4704_v30, 5  ;;  %v3244_v47 = vrot.slane %v2111_v37, 9  ;;  %v2237_v51 = vld [vmem:[#allocation2 + $0x10] sm:$0xee]  ;;  %v1707_v14 = vrot.slane %v1705_v6, 4  ;;  %v1710_v15 = vrot.slane %v1708_v7, 5 }
 0x2cf   :  { %3763 = vmatprep.subr.bf16.mxu0 %v4095_v2  ;;  %v1860_v31 = vrot.slane %v1858_v26, 5  ;;  %v1702_v52 = vld [vmem:[#allocation2 + $0x10] sm:$0xf]  ;;  %v3271_v63 = vrot.slane %v2237_v51, 9  ;;  %v2245_v8 = vsel %vm4331_vm4, %v3270_v4, %v2244_v62  ;;  %v1714_v19 = vshll.u32 %v4704_v30, 16  ;;  %v4036_v25 = vld [vmem:[%s5123_s3 + $0x178] sm:$0xff]  }
 0x2d0   :  { %v1847_v29 = vld [vmem:[#allocation2 + $0x18] sm:$0x11]  ;;  %v4723_v55 = vsel %vm4331_vm4, %v3243_v44, %v2118_v43  ;;  %v1719_v0 = vshrl.u32 %v1702_v52, 16  ;;  %v1722_v1 = vshll.u32 %v1702_v52, 16  ;;  %v1711_v18 = vor.u32 %v1710_v15, %v1707_v14  ;;  %v4048_v30 = vld [vmem:[%s5123_s3 + $0x148] sm:$0xff]   ;;  %v4058_v62 = vld [vmem:[%s5123_s3 + $0x1e0] sm:$0xff]  }
 0x2d1   :  { %v1872_v33 = vshll.u32 %v1847_v29, 16  ;;  %v4706_v36 = vld [vmem:[#allocation2 + $0x18] sm:$0x1]  ;;  %v1861_v45 = vsel %vm4311_vm14, %v1856_v39, %v1860_v31  ;;  %v2248_v54 = vrot.slane %v1847_v29, 5  ;;  %v1716_v21 = vrot.slane %v1714_v19, 5  ;;  %v4046_v29 = vld [vmem:[%s5123_s3 + $0x150] sm:$0xff]  }
 0x2d2   :  { %3764 = vmatpush3.bf16.msra.mxu0 %v4025_v32  ;;  %v2122_v48 = vrot.slane %v4706_v36, 5  ;;  %v1721_v9 = vrot.slane %v1719_v0, 4  ;;  %v1724_v10 = vrot.slane %v1722_v1, 5  ;;  %v1728_v40 = vshll.u32 %v4706_v36, 16  ;;  %v4038_v32 = vld [vmem:[%s5123_s3 + $0x170] sm:$0xff]   ;;  %v4050_v31 = vld [vmem:[%s5123_s3 + $0x140] sm:$0xff]  }
 0x2d3   :  { %v1874_v42 = vrot.slane %v1872_v33, 5  ;;  %3765 = vmatprep.subr.bf16.mxu0 %v4095_v2  ;;  %v2249_v5 = vsel %vm4331_vm4, %v3271_v63, %v2248_v54  ;;  %v1712_v61 = vrot.slane %v1711_v18, 4  ;;  %v4045_v33 = vld [vmem:[%s5123_s3 + $0xb8] sm:$0xff]   ;;  %v4049_v39 = vld [vmem:[%s5123_s3 + $0xa8] sm:$0xff]   ;;  %v4059_v54 = vld [vmem:[%s5123_s3 + $0x80] sm:$0xff]  }
 0x2d4   :  { %v4727_v56 = vsel %vm4331_vm4, %v3244_v47, %v2122_v48  ;;  %v3289_v11 = vcombine.high %v2245_v8, %v2249_v5  ;;  %v3288_v12 = vcombine.low %v2245_v8, %v2249_v5  ;;  %v1725_v16 = vor.u32 %v1724_v10, %v1721_v9  ;;  %v4053_v44 = vld [vmem:[%s5123_s3 + $0x98] sm:$0xff]   ;;  %v4055_v47 = vld [vmem:[%s5123_s3 + $0x90] sm:$0xff]   ;;  %v4057_v52 = vld [vmem:[%s5123_s3 + $0x88] sm:$0xff]  }
 0x2d5   :  { %v1875_v46 = vsel %vm4311_vm14, %v1870_v41, %v1874_v42  ;;  %v3261_v60 = vcombine.low %v4723_v55, %v4727_v56  ;;  %v1730_v58 = vrot.slane %v1728_v40, 5  ;;  %v1717_v24 = vsel %vm4311_vm14, %v1712_v61, %v1716_v21  ;;  %v4051_v41 = vld [vmem:[%s5123_s3 + $0xa0] sm:$0xff]   ;;  %v4052_v48 = vld [vmem:[%s5123_s3 + $0x1f8] sm:$0xff]   ;;  %v4063_v0 = vld [vmem:[%s5123_s3 + $0x130] sm:$0xff]  }
 0x2d6   :  { %v3210_v49 = vcombine.high %v1861_v45, %v1875_v46  ;;  %v3209_v50 = vcombine.low %v1861_v45, %v1875_v46  ;;  %3766 = vmatpush3.bf16.msra.mxu0 %v4026_v38  ;;  %v1726_v34 = vrot.slane %v1725_v16, 4  ;;  %v4047_v38 = vld [vmem:[%s5123_s3 + $0xb0] sm:$0xff]   ;;  %v4061_v59 = vld [vmem:[%s5123_s3 + $0x138] sm:$0xff]   ;;  %v4067_v5 = vld [vmem:[%s5123_s3 + $0x120] sm:$0xff]  }
 0x2d7   :  { %3767 = vmatprep.subr.bf16.mxu0 %v4095_v2  ;;  %v4060_v1 = vld [vmem:[%s5123_s3 + $0x1d8] sm:$0xff]   ;;  %v4062_v4 = vld [vmem:[%s5123_s3 + $0x1d0] sm:$0xff]   ;;  %v4064_v6 = vld [vmem:[%s5123_s3 + $0x1c8] sm:$0xff]  }
 0x2d8   :  { %1901 = vrot.lane.b32.xlu1 %v3210_v49, %s4099_s17  ;;  %1899 = vrot.lane.b32.xlu0 %v3209_v50, %s4099_s17  ;;  %v1731_v23 = vsel %vm4311_vm14, %v1726_v34, %v1730_v58  ;;  %v4068_v7 = vld [vmem:[%s5123_s3 + $0x118] sm:$0xff]   ;;  %v4066_v8 = vld [vmem:[%s5123_s3 + $0x1c0] sm:$0xff]  }
 0x2d9   :  { %v3184_v26 = vcombine.low %v1717_v24, %v1731_v23  ;;  %v4071_v14 = vld [vmem:[%s5123_s3 + $0x100] sm:$0xff]   ;;  %v4072_v15 = vld [vmem:[%s5123_s3 + $0x1b8] sm:$0xff]   ;;  %v4073_v40 = vld [vmem:[%s5123_s3 + $0x1b0] sm:$0xff]  }
 0x2da   :  { %3768 = vmatpush3.bf16.msra.mxu0 %v4027_v53  ;;  %v4054_v53 = vld [vmem:[%s5123_s3 + $0x1f0] sm:$0xff]   ;;  %v4075_v18 = vld [vmem:[%s5123_s3 + $0x1a0] sm:$0xff]   ;;  %v4076_v19 = vld [vmem:[%s5123_s3 + $0x198] sm:$0xff]  }
 0x2db   :  { %3769 = vmatprep.subr.bf16.mxu0 %v4095_v2  ;;  %v4077_v34 = vld [vmem:[%s5123_s3 + $0x190] sm:$0xff]   ;;  %v4078_v61 = vld [vmem:[%s5123_s3 + $0x188] sm:$0xff]   ;;  %v4079_v24 = vld [vmem:[%s5123_s3 + $0x180] sm:$0xff]  }
 0x2dc   :  { %2015 = vrot.lane.b32.xlu1 %v3210_v49, %s4100_s20  ;;  %2013 = vrot.lane.b32.xlu0 %v3209_v50, %s4100_s20  ;;  %v4083_v55 = vld [vmem:[%s5123_s3 + $0x220] sm:$0xff]   ;;  %v4084_v56 = vld [vmem:[%s5123_s3 + $0x218] sm:$0xff]  }
 0x2de   :  { %3770 = vmatpush3.bf16.msra.mxu0 %v4028_v3  ;;  %v4065_v3 = vld [vmem:[%s5123_s3 + $0x128] sm:$0xff]  }
 0x2df   :  { %3771 = vmatprep.subr.bf16.mxu0 %v4095_v2 }
 0x2e0   :  { %2275 = vrot.lane.b32.xlu1 %v3289_v11, %s4099_s17  ;;  %2273 = vrot.lane.b32.xlu0 %v3288_v12, %s4099_s17 }
 0x2e2   :  { %3772 = vmatpush3.bf16.msra.mxu0 %v4029_v13  ;;  %v4070_v13 = vld [vmem:[%s5123_s3 + $0x108] sm:$0xff]  }
 0x2e3   :  { %3773 = vmatprep.subr.bf16.mxu0 %v4095_v2 }
 0x2e4   :  { %2389 = vrot.lane.b32.xlu1 %v3289_v11, %s4100_s20  ;;  %2387 = vrot.lane.b32.xlu0 %v3288_v12, %s4100_s20  ;;  %v4069_v11 = vld [vmem:[%s5123_s3 + $0x110] sm:$0xff]  }
 0x2e6   :  { %3774 = vmatpush3.bf16.msra.mxu0 %v4030_v17  ;;  %v4074_v17 = vld [vmem:[%s5123_s3 + $0x1a8] sm:$0xff]  }
 0x2e7   :  { %3775 = vmatprep.subr.bf16.mxu0 %v4095_v2 }
 0x2ea   :  { %3776 = vmatpush3.bf16.msra.mxu0 %v4031_v20 }
 0x2eb   :  { %3801 = vmatprep.subr.bf16.mxu0 %v4095_v2 }
 0x2ed   :  { %3778 = vmatmul.mubr.bf16.vlgmr.msra.gmra.mxu0 %v3184_v26  ;;  %v4081_v26 = vld [vmem:[%s5123_s3 + $0x230] sm:$0xff]  }
 0x2ee   :  { %3802 = vmatpush3.bf16.msra.mxu0 %v4036_v25  ;;  %3817 = vmatprep.mubr.msk.bf16.mxu0 %vm4098_vm10, %v4095_v2  ;;  %v4080_v25 = vld [vmem:[%s5123_s3 + $0x238] sm:$0xff]  }
 0x2ef   :  { %3803 = vmatprep.subr.bf16.mxu0 %v4095_v2 }
 0x2f2   :  { %3804 = vmatpush3.bf16.msra.mxu0 %v4038_v32  ;;  %v4082_v32 = vld [vmem:[%s5123_s3 + $0x228] sm:$0xff]  }
 0x2f3   :  { %3805 = vmatprep.subr.bf16.mxu0 %v4095_v2 }
 0x2f6   :  { %3806 = vmatpush3.bf16.msra.mxu0 %v4040_v22 }
 0x2f7   :  { %3807 = vmatprep.subr.bf16.mxu0 %v4095_v2 }
 0x2fa   :  { %3808 = vmatpush3.bf16.msra.mxu0 %v4042_v27 }
 0x2fb   :  { %3809 = vmatprep.subr.bf16.mxu0 %v4095_v2 }
 0x2fe   :  { %3810 = vmatpush3.bf16.msra.mxu0 %v4044_v28  ;;  %v4086_v28 = vld [vmem:[%s5123_s3 + $0x208] sm:$0xff]  }
 0x2ff   :  { %3811 = vmatprep.subr.bf16.mxu0 %v4095_v2 }
 0x302   :  { %3812 = vmatpush3.bf16.msra.mxu0 %v4046_v29 }
 0x303   :  { %3813 = vmatprep.subr.bf16.mxu0 %v4095_v2 }
 0x306   :  { %3814 = vmatpush3.bf16.msra.mxu0 %v4048_v30 }
 0x307   :  { %3815 = vmatprep.subr.bf16.mxu0 %v4095_v2 }
 0x30a   :  { %3816 = vmatpush3.bf16.msra.mxu0 %v4050_v31  ;;  %v4087_v31 = vld [vmem:[%s5123_s3 + $0x200] sm:$0xff]  }
 0x30b   :  { %3841 = vmatprep.subr.bf16.mxu0 %v4095_v2 }
 0x339   :  { %v1397_v35 = vpop.permute.xlu0 %1396  ;;  %v1399_v36 = vpop.permute.xlu1 %1398 }
 0x33a   :  { %v1400_v37 = vsel %vm193_vm2, %v1397_v35, %v1399_v36 }
 0x33b   :  { %3718 = vmatmul.mubr.bf16.vlgmr.msra.gmra.mxu1 %v1400_v37  ;;  %v2520_v37 = vld [vmem:[%s5125_s9 + $0x78] sm:$0xff] }
 0x33c   :  { %3742 = vmatpush3.bf16.msra.mxu1 %v4045_v33  ;;  %3757 = vmatprep.mubr.msk.bf16.mxu1 %vm4098_vm10, %v4095_v2 }
 0x33d   :  { %3743 = vmatprep.subr.bf16.mxu1 %v4095_v2  ;;  %v1604_v42 = vpop.permute.xlu0 %1603  ;;  %v1606_v43 = vpop.permute.xlu1 %1605 }
 0x33e   :  { %v1607_v63 = vsel %vm401_vm6, %v1604_v42, %v1606_v43  ;;  %v2516_v42 = vld [vmem:[%s5125_s9 + $0x58] sm:$0xff] }
 0x340   :  { %3744 = vmatpush3.bf16.msra.mxu1 %v4047_v38  ;;  %v2519_v38 = vld [vmem:[%s5125_s9 + $0x70] sm:$0xff] }
 0x341   :  { %3745 = vmatprep.subr.bf16.mxu1 %v4095_v2 }
 0x344   :  { %3746 = vmatpush3.bf16.msra.mxu1 %v4049_v39  ;;  %v2518_v39 = vld [vmem:[%s5125_s9 + $0x68] sm:$0xff] }
 0x345   :  { %3747 = vmatprep.subr.bf16.mxu1 %v4095_v2 }
 0x348   :  { %3748 = vmatpush3.bf16.msra.mxu1 %v4051_v41  ;;  %v2517_v41 = vld [vmem:[%s5125_s9 + $0x60] sm:$0xff] }
 0x349   :  { %3749 = vmatprep.subr.bf16.mxu1 %v4095_v2 }
 0x34a   :  { %v4823_v45 = vpop.permute.xlu0 %1899  ;;  %v4825_v46 = vpop.permute.xlu1 %1901 }
 0x34b   :  { %v1903_v16 = vsel %vm193_vm2, %v4823_v45, %v4825_v46 }
 0x34c   :  { %3750 = vmatpush3.bf16.msra.mxu1 %v4053_v44 }
 0x34d   :  { %3751 = vmatprep.subr.bf16.mxu1 %v4095_v2 }
 0x34e   :  { %v2014_v49 = vpop.permute.xlu0 %2013  ;;  %v2016_v50 = vpop.permute.xlu1 %2015 }
 0x34f   :  { %v2017_v51 = vsel %vm401_vm6, %v2014_v49, %v2016_v50  ;;  %v2513_v49 = vld [vmem:[%s5125_s9 + $0x40] sm:$0xff]  ;;  %v2512_v50 = vld [vmem:[%s5125_s9 + $0x38] sm:$0xff] }
 0x350   :  { %3818 = vmatmul.mubr.bf16.vlgmr.msra.gmra.mxu0 %v2017_v51  ;;  %3752 = vmatpush3.bf16.msra.mxu1 %v4055_v47  ;;  %v2515_v47 = vld [vmem:[%s5125_s9 + $0x50] sm:$0xff] }
 0x351   :  { %3842 = vmatpush3.bf16.msra.mxu0 %v4052_v48  ;;  %3753 = vmatprep.subr.bf16.mxu1 %v4095_v2  ;;  %v2514_v48 = vld [vmem:[%s5125_s9 + $0x48] sm:$0xff]  ;;  %v2511_v51 = vld [vmem:[%s5125_s9 + $0x30] sm:$0xff] }
 0x352   :  { %3843 = vmatprep.subr.bf16.mxu0 %v4095_v2  ;;  %3857 = vmatprep.mubr.msk.bf16.mxu0 %vm4098_vm10, %v4095_v2  ;;  %v2274_v9 = vpop.permute.xlu0 %2273  ;;  %v2276_v10 = vpop.permute.xlu1 %2275 }
 0x353   :  { %v2277_v12 = vsel %vm193_vm2, %v2274_v9, %v2276_v10 }
 0x354   :  { %3754 = vmatpush3.bf16.msra.mxu1 %v4057_v52  ;;  %v2510_v52 = vld [vmem:[%s5125_s9 + $0x28] sm:$0xff] }
 0x355   :  { %3844 = vmatpush3.bf16.msra.mxu0 %v4054_v53  ;;  %3755 = vmatprep.subr.bf16.mxu1 %v4095_v2  ;;  %v2509_v53 = vld [vmem:[%s5125_s9 + $0x20] sm:$0xff] }
 0x356   :  { %3845 = vmatprep.subr.bf16.mxu0 %v4095_v2  ;;  %v2388_v33 = vpop.permute.xlu0 %2387  ;;  %v2390_v35 = vpop.permute.xlu1 %2389 }
 0x357   :  { %v2391_v36 = vsel %vm401_vm6, %v2388_v33, %v2390_v35 }
 0x358   :  { %3756 = vmatpush3.bf16.msra.mxu1 %v4059_v54  ;;  %v2508_v54 = vld [vmem:[%s5125_s9 + $0x18] sm:$0xff] }
 0x359   :  { %3846 = vmatpush3.bf16.msra.mxu0 %v4056_v57  ;;  %3781 = vmatprep.subr.bf16.mxu1 %v4095_v2  ;;  %v2507_v57 = vld [vmem:[%s5125_s9 + $0x10] sm:$0xff] }
 0x35a   :  { %3847 = vmatprep.subr.bf16.mxu0 %v4095_v2 }
 0x35b   :  { %3758 = vmatmul.mubr.bf16.vlgmr.msra.gmra.mxu1 %v1607_v63 }
 0x35c   :  { %3782 = vmatpush3.bf16.msra.mxu1 %v4061_v59  ;;  %3797 = vmatprep.mubr.msk.bf16.mxu1 %vm4098_vm10, %v4095_v2 }
 0x35d   :  { %3848 = vmatpush3.bf16.msra.mxu0 %v4058_v62  ;;  %3783 = vmatprep.subr.bf16.mxu1 %v4095_v2  ;;  %v2506_v62 = vld [vmem:[%s5125_s9 + $0x8] sm:$0xff] }
 0x35e   :  { %3849 = vmatprep.subr.bf16.mxu0 %v4095_v2 }
 0x360   :  { %3784 = vmatpush3.bf16.msra.mxu1 %v4063_v0  ;;  %v2598_v0 = vld [vmem:[%s5126_s5 + $0x8] sm:$0xff] }
 0x361   :  { %3850 = vmatpush3.bf16.msra.mxu0 %v4060_v1  ;;  %3785 = vmatprep.subr.bf16.mxu1 %v4095_v2  ;;  %v2597_v1 = vld [vmem:[%s5126_s5] sm:$0xff] }
 0x362   :  { %3851 = vmatprep.subr.bf16.mxu0 %v4095_v2 }
 0x364   :  { %3786 = vmatpush3.bf16.msra.mxu1 %v4065_v3  ;;  %v2505_v3 = vld [vmem:[%s5125_s9] sm:$0xff] }
 0x365   :  { %3852 = vmatpush3.bf16.msra.mxu0 %v4062_v4  ;;  %3787 = vmatprep.subr.bf16.mxu1 %v4095_v2 }
 0x366   :  { %3853 = vmatprep.subr.bf16.mxu0 %v4095_v2 }
 0x368   :  { %3788 = vmatpush3.bf16.msra.mxu1 %v4067_v5 }
 0x369   :  { %3854 = vmatpush3.bf16.msra.mxu0 %v4064_v6  ;;  %3789 = vmatprep.subr.bf16.mxu1 %v4095_v2 }
 0x36a   :  { %3855 = vmatprep.subr.bf16.mxu0 %v4095_v2 }
 0x36c   :  { %3790 = vmatpush3.bf16.msra.mxu1 %v4068_v7 }
 0x36d   :  { %3856 = vmatpush3.bf16.msra.mxu0 %v4066_v8  ;;  %3791 = vmatprep.subr.bf16.mxu1 %v4095_v2 }
 0x36e   :  { %3881 = vmatprep.subr.mxu0 %v4095_v2 }
 0x370   :  { %3858 = vmatmul.mubr.bf16.vlgmr.msra.gmra.mxu0 %v2277_v12  ;;  %3792 = vmatpush3.bf16.msra.mxu1 %v4069_v11 }
 0x371   :  { %3793 = vmatprep.subr.bf16.mxu1 %v4095_v2  ;;  %3913 = vmatprep.mubr.msk.f32.mxu0 %vm4098_vm10, %v4095_v2 }
 0x372   :  { %3882 = vmatpush3.msra.mxu0 %v2520_v37 }
 0x373   :  { %3883 = vmatprep.subr.mxu0 %v4095_v2 }
 0x374   :  { %3794 = vmatpush3.bf16.msra.mxu1 %v4070_v13  ;;  %3884 = vmatpush3.msra.mxu0 %v2519_v38 }
 0x375   :  { %3795 = vmatprep.subr.bf16.mxu1 %v4095_v2  ;;  %3885 = vmatprep.subr.mxu0 %v4095_v2 }
 0x376   :  { %3886 = vmatpush3.msra.mxu0 %v2518_v39 }
 0x377   :  { %3887 = vmatprep.subr.mxu0 %v4095_v2 }
 0x378   :  { %3796 = vmatpush3.bf16.msra.mxu1 %v4071_v14  ;;  %3888 = vmatpush3.msra.mxu0 %v2517_v41 }
 0x379   :  { %3821 = vmatprep.subr.bf16.mxu1 %v4095_v2  ;;  %3889 = vmatprep.subr.mxu0 %v4095_v2 }
 0x37a   :  { %3890 = vmatpush3.msra.mxu0 %v2516_v42 }
 0x37b   :  { %3798 = vmatmul.mubr.bf16.vlgmr.msra.gmra.mxu1 %v1903_v16  ;;  %3891 = vmatprep.subr.mxu0 %v4095_v2 }
 0x37c   :  { %3822 = vmatpush3.bf16.msra.mxu1 %v4072_v15  ;;  %3837 = vmatprep.mubr.msk.bf16.mxu1 %vm4098_vm10, %v4095_v2 }
 0x37d   :  { %3823 = vmatprep.subr.bf16.mxu1 %v4095_v2  ;;  %3892 = vmatpush3.msra.mxu0 %v2515_v47 }
 0x37e   :  { %3893 = vmatprep.subr.mxu0 %v4095_v2 }
 0x37f   :  { %3894 = vmatpush3.msra.mxu0 %v2514_v48 }
 0x380   :  { %3824 = vmatpush3.bf16.msra.mxu1 %v4073_v40  ;;  %3895 = vmatprep.subr.mxu0 %v4095_v2 }
 0x381   :  { %3825 = vmatprep.subr.bf16.mxu1 %v4095_v2  ;;  %3896 = vmatpush3.msra.mxu0 %v2513_v49 }
 0x382   :  { %3897 = vmatprep.subr.mxu0 %v4095_v2 }
 0x383   :  { %3898 = vmatpush3.msra.mxu0 %v2512_v50 }
 0x384   :  { %3826 = vmatpush3.bf16.msra.mxu1 %v4074_v17  ;;  %3899 = vmatprep.subr.mxu0 %v4095_v2 }
 0x385   :  { %3827 = vmatprep.subr.bf16.mxu1 %v4095_v2  ;;  %3900 = vmatpush3.msra.mxu0 %v2511_v51 }
 0x386   :  { %3901 = vmatprep.subr.mxu0 %v4095_v2 }
 0x387   :  { %3902 = vmatpush3.msra.mxu0 %v2510_v52 }
 0x388   :  { %3828 = vmatpush3.bf16.msra.mxu1 %v4075_v18  ;;  %3903 = vmatprep.subr.mxu0 %v4095_v2 }
 0x389   :  { %3829 = vmatprep.subr.bf16.mxu1 %v4095_v2  ;;  %3904 = vmatpush3.msra.mxu0 %v2509_v53 }
 0x38a   :  { %3905 = vmatprep.subr.mxu0 %v4095_v2 }
 0x38b   :  { %3906 = vmatpush3.msra.mxu0 %v2508_v54 }
 0x38c   :  { %3830 = vmatpush3.bf16.msra.mxu1 %v4076_v19  ;;  %3907 = vmatprep.subr.mxu0 %v4095_v2 }
 0x38d   :  { %3831 = vmatprep.subr.bf16.mxu1 %v4095_v2  ;;  %v4941_v58 = vpop.f32.mrf.mxu0  ;;  %3908 = vmatpush3.msra.mxu0 %v2507_v57 }
 0x38e   :  { %3909 = vmatprep.subr.mxu0 %v4095_v2 }
 0x38f   :  { %v3739_v20 = vpop.f32.mrf.mxu0  ;;  %3910 = vmatpush3.msra.mxu0 %v2506_v62  ;;  %v3323_v62 = vld [vmem:[%s5129_s6] ss:$0 sm:$0xff] }
 0x390   :  { %3832 = vmatpush3.bf16.msra.mxu1 %v4077_v34  ;;  %3911 = vmatprep.subr.mxu0 %v4095_v2 }
 0x391   :  { %3833 = vmatprep.subr.bf16.mxu1 %v4095_v2  ;;  %v4947_v21 = vpop.f32.mrf.mxu0  ;;  %3912 = vmatpush3.msra.mxu0 %v2505_v3 }
 0x393   :  { %v3740_v23 = vpop.f32.mrf.mxu0 }
 0x394   :  { %3834 = vmatpush3.bf16.msra.mxu1 %v4078_v61 }
 0x395   :  { %3835 = vmatprep.subr.bf16.mxu1 %v4095_v2 }
 0x398   :  { %3836 = vmatpush3.bf16.msra.mxu1 %v4079_v24 }
 0x399   :  { %3861 = vmatprep.subr.bf16.mxu1 %v4095_v2 }
 0x39b   :  { %3838 = vmatmul.mubr.bf16.vlgmr.msra.gmra.mxu1 %v3261_v60  ;;  %v4085_v60 = vld [vmem:[%s5123_s3 + $0x210] sm:$0xff]  }
 0x39c   :  { %3862 = vmatpush3.bf16.msra.mxu1 %v4080_v25  ;;  %3877 = vmatprep.mubr.msk.bf16.mxu1 %vm4098_vm10, %v4095_v2 }
 0x39d   :  { %3863 = vmatprep.subr.bf16.mxu1 %v4095_v2 }
 0x3a0   :  { %3864 = vmatpush3.bf16.msra.mxu1 %v4081_v26 }
 0x3a1   :  { %3865 = vmatprep.subr.bf16.mxu1 %v4095_v2 }
 0x3a4   :  { %3866 = vmatpush3.bf16.msra.mxu1 %v4082_v32 }
 0x3a5   :  { %3867 = vmatprep.subr.bf16.mxu1 %v4095_v2 }
 0x3a8   :  { %3868 = vmatpush3.bf16.msra.mxu1 %v4083_v55 }
 0x3a9   :  { %3869 = vmatprep.subr.bf16.mxu1 %v4095_v2 }
 0x3ac   :  { %3870 = vmatpush3.bf16.msra.mxu1 %v4084_v56 }
 0x3ad   :  { %3871 = vmatprep.subr.bf16.mxu1 %v4095_v2  ;;  %v4982_v22 = vpop.f32.mrf.mxu0 }
 0x3af   :  { %v3779_v27 = vpop.f32.mrf.mxu0 }
 0x3b0   :  { %3872 = vmatpush3.bf16.msra.mxu1 %v4085_v60 }
 0x3b1   :  { %3873 = vmatprep.subr.bf16.mxu1 %v4095_v2  ;;  %v4988_v29 = vpop.f32.mrf.mxu0 }
 0x3b3   :  { %v3780_v30 = vpop.f32.mrf.mxu0 }
 0x3b4   :  { %3874 = vmatpush3.bf16.msra.mxu1 %v4086_v28 }
 0x3b5   :  { %3875 = vmatprep.subr.bf16.mxu1 %v4095_v2 }
 0x3b8   :  { %3876 = vmatpush3.bf16.msra.mxu1 %v4087_v31 }
 0x3b9   :  { %3916 = vmatprep.subr.mxu1 %v4095_v2 }
 0x3bb   :  { %3878 = vmatmul.mubr.bf16.vlgmr.msra.gmra.mxu1 %v2391_v36 }
 0x3bc   :  { %3920 = vmatprep.mubr.msk.f32.mxu1 %vm4098_vm10, %v4095_v2  ;;  %3917 = vmatpush3.msra.mxu1 %v2598_v0 }
 0x3bd   :  { %3918 = vmatprep.subr.mxu1 %v4095_v2 }
 0x3be   :  { %3919 = vmatpush3.msra.mxu1 %v2597_v1 }
 0x3bf   :  { %3923 = vmatprep.subr.mxu1 %v4095_v2 }
 0x3fb   :  { %v1484_v43 = vpop.f32.mrf.mxu1 }
 0x3fc   :  { %v1580_v6 = vadd.f32 %v4941_v58, %v1484_v43 }
 0x3fd   :  { %v3719_v44 = vpop.f32.mrf.mxu1 }
 0x3ff   :  { %v1487_v45 = vpop.f32.mrf.mxu1 }
 0x400   :  { %v1583_v10 = vadd.f32 %v4947_v21, %v1487_v45 }
 0x401   :  { %v3720_v46 = vpop.f32.mrf.mxu1 }
 0x410   :  { %v2101_v59 = vpop.f32.mrf.mxu0 }
 0x412   :  { %v3819_v63 = vpop.f32.mrf.mxu0 }
 0x414   :  { %v2104_v4 = vpop.f32.mrf.mxu0 }
 0x416   :  { %v3820_v5 = vpop.f32.mrf.mxu0 }
 0x417   :  { %v2773_v5 = vld [vmem:[%s5130_s10] sm:$0xff] }
 0x41b   :  { %v1691_v7 = vpop.f32.mrf.mxu1 }
 0x41c   :  { %v1698_v8 = vadd.f32 %v1691_v7, %v1580_v6  ;;  %v3325_v6 = vld [vmem:[%s5131_s8] ss:$0 sm:$0xff] }
 0x41d   :  { %v3759_v9 = vpop.f32.mrf.mxu1 }
 0x41e   :  { %v1842_v17 = vadd.f32 %v4982_v22, %v1698_v8  ;;  %v3322_v22 = vld [vmem:[%s5127_s4] ss:$0 sm:$0xff] }
 0x41f   :  { %v1694_v11 = vpop.f32.mrf.mxu1 }
 0x420   :  { %v1699_v12 = vadd.f32 %v1694_v11, %v1583_v10 }
 0x421   :  { %v3760_v13 = vpop.f32.mrf.mxu1 }
 0x422   :  { %v1843_v20 = vadd.f32 %v4988_v29, %v1699_v12 }
 0x430   :  { %v2361_v14 = vpop.f32.mrf.mxu0 }
 0x432   :  { %v3859_v15 = vpop.f32.mrf.mxu0 }
 0x434   :  { %v2364_v16 = vpop.f32.mrf.mxu0 }
 0x436   :  { %v3860_v40 = vpop.f32.mrf.mxu0 }
 0x43b   :  { %v1987_v18 = vpop.f32.mrf.mxu1 }
 0x43c   :  { %v1994_v19 = vadd.f32 %v1987_v18, %v1842_v17 }
 0x43d   :  { %v3799_v34 = vpop.f32.mrf.mxu1 }
 0x43e   :  { %v2108_v58 = vadd.f32 %v2101_v59, %v1994_v19  ;;  %v2681_v59 = vld [vmem:[%s5128_s7] sm:$0xf] }
 0x43f   :  { %v1990_v61 = vpop.f32.mrf.mxu1 }
 0x440   :  { %v1995_v23 = vadd.f32 %v1990_v61, %v1843_v20 }
 0x441   :  { %v3800_v24 = vpop.f32.mrf.mxu1 }
 0x442   :  { %v2109_v25 = vadd.f32 %v2104_v4, %v1995_v23  ;;  %v2774_v4 = vld [vmem:[%s5130_s10 + $0x8] sm:$0xff] }
 0x45b   :  { %v2227_v21 = vpop.f32.mrf.mxu1 }
 0x45c   :  { %v2234_v26 = vadd.f32 %v2227_v21, %v2108_v58 }
 0x45d   :  { %v3839_v32 = vpop.f32.mrf.mxu1 }
 0x45e   :  { %v2368_v55 = vadd.f32 %v2361_v14, %v2234_v26  ;;  %v4101_v14 = vmov 1966171168   ;;  %v4093_v32 = vld [vmem:[%s5121_s0] sm:$0xff] }
 0x45f   :  { %v2230_v56 = vpop.f32.mrf.mxu1  ;;  %v2850_v15 = vunpack.c.l.s4 %v4101_v14 }
 0x460   :  { %v2235_v60 = vadd.f32 %v2230_v56, %v2109_v25  ;;  %v4094_v56 = vld [vmem:[%s5121_s0 + $0x8] sm:$0xff] }
 0x461   :  { %v3840_v27 = vpop.f32.mrf.mxu1 }
 0x462   :  { %v2369_v28 = vadd.f32 %v2364_v16, %v2235_v60  ;;  %v2852_v16 = vlaneseq }
 0x464   :  { %v2853_v40 = vshrl.u32 %v2852_v16, 7 }
 0x466   :  { %v2873_v34 = vsub.s32 0, %v2853_v40 }
 0x47b   :  { %v2475_v30 = vpop.f32.mrf.mxu1 }
 0x47c   :  { %v2482_v31 = vadd.f32 %v2475_v30, %v2368_v55 }
 0x47d   :  { %v3879_v29 = vpop.f32.mrf.mxu1 }
 0x47e   :  { %v5076_v33 = vadd.f32 %v3322_v22, %v2482_v31 }
 0x47f   :  { %v2478_v35 = vpop.f32.mrf.mxu1 }
 0x480   :  { %v2493_v36 = vrot.slane %v5076_v33, 4  ;;  %v2483_v37 = vadd.f32 %v2478_v35, %v2369_v28 }
 0x481   :  { %v3880_v38 = vpop.f32.mrf.mxu1 }
 0x482   :  { %v2494_v39 = vadd.f32 %v2493_v36, %v5076_v33  ;;  %v5080_v41 = vadd.f32 %v3322_v22, %v2483_v37 }
 0x484   :  { %v2495_v42 = vrot.slane %v2494_v39, 2  ;;  %v2499_v43 = vrot.slane %v5080_v41, 4 }
 0x486   :  { %v2496_v44 = vadd.f32 %v2495_v42, %v2494_v39  ;;  %v2500_v45 = vadd.f32 %v2499_v43, %v5080_v41 }
 0x488   :  { %v2501_v46 = vrot.slane %v2500_v45, 2  ;;  %v2497_v48 = vrot.slane %v2496_v44, 1 }
 0x48a   :  { %v2502_v47 = vadd.f32 %v2501_v46, %v2500_v45  ;;  %v2498_v50 = vadd.f32 %v2497_v48, %v2496_v44 }
 0x48c   :  { %v2503_v49 = vrot.slane %v2502_v47, 1 }
 0x48e   :  { %v2504_v51 = vadd.f32 %v2503_v49, %v2502_v47 }
 0x490   :  { %v2524_v52 = vsel %vm2523_vm7, %v2504_v51, %v2498_v50 }
 0x491   :  { %3914 = vmatmul.mubr.f32.vlgmr.msra.gmra.mxu0 %v2524_v52 }
 0x551   :  { %v2592_v53 = vpop.f32.mrf.mxu0 }
 0x552   :  { %v2596_v54 = vmul.f32 0.015625, %v2592_v53 }
 0x553   :  { %v3915_v57 = vpop.f32.mrf.mxu0 }
 0x554   :  { %3921 = vmatmul.mubr.msk.f32.vlgmr.msra.gmra.mxu1 %vm113_vm8, %v2596_v54 }
 0x555   :  { %3925 = vmatprep.mubr.msk.f32.mxu1 %vm4098_vm10, %v4095_v2  ;;  %3924 = vmatpush3.msk.msra.mxu1 %vm2693_vm1, %v2681_v59 }
 0x556   :  { %3928 = vmatprep.subr.mxu1 %v4095_v2 }
 0x614   :  { %v2676_v63 = vpop.f32.mrf.mxu1 }
 0x615   :  { %v2677_v0 = vadd.f32 %v3323_v62, %v2676_v63 }
 0x616   :  { %v3922_v1 = vpop.f32.mrf.mxu1 }
 0x617   :  { %v2680_v3 = vmax.f32 %v2677_v0, 0.0 }
 0x619   :  { %3926 = vmatmul.mubr.msk.f32.vlgmr.msra.gmra.mxu1 %vm2689_vm12, %v2680_v3 }
 0x61a   :  { %3932 = vmatprep.mubr.msk.f32.mxu1 %vm4098_vm10, %v4095_v2  ;;  %3929 = vmatpush3.msra.mxu1 %v2774_v4 }
 0x61b   :  { %3930 = vmatprep.subr.mxu1 %v4095_v2  ;;  %v2851_v2 = vunpack.c.0.s8 %v2850_v15 }
 0x61c   :  { %3931 = vmatpush3.msra.mxu1 %v2773_v5 }
 0x61d   :  { %v2854_v17 = vsub.s32 %v2851_v2, %v2853_v40 }
 0x6d9   :  { %v2763_v7 = vpop.f32.mrf.mxu1 }
 0x6da   :  { %v2764_v8 = vadd.f32 %v3325_v6, %v2763_v7 }
 0x6db   :  { %v3927_v9 = vpop.f32.mrf.mxu1 }
 0x6dc   :  { %v3328_v10 = vmul.f32 -1.442695, %v2764_v8 }
 0x6de   :  { %4088 = vpow2.f32 %v3328_v10 }
 0x6eb   :  { %v4089_v11 = vpop.eup %4088 }
 0x6ec   :  { %v2770_v12 = vadd.f32 1.0, %v4089_v11 }
 0x6ee   :  { %4090 = vrcp.f32 %v2770_v12 }
 0x6fb   :  { %v4091_v13 = vpop.eup %4090 }
 0x6fc   :  { %3933 = vmatmul.mubr.msk.f32.vlgmr.msra.gmra.mxu1 %vm113_vm8, %v4091_v13 }
 0x7bc   :  { %v2844_v18 = vpop.f32.mrf.mxu1 }
 0x7bd   :  { %v2855_v19 = vrot.slane %v2844_v18, %v2854_v17 }
 0x7be   :  { %v3934_v20 = vpop.f32.mrf.mxu1 }
 0x7bf   :  { %v2856_v58 = vcombine.high %v2855_v19, %v2855_v19  ;;  %v2863_v61 = vrot.slane %v2855_v19, %v2854_v17 }
 0x7c1   :  { %v2870_v23 = vrot.slane %v2856_v58, %v2854_v17  ;;  %v2874_v24 = vrot.slane %v2863_v61, %v2873_v34 }
 0x7c3   :  { %v2878_v25 = vrot.slane %v2870_v23, %v2873_v34  ;;  %v2881_v21 = vmul.f32 %v2874_v24, %v5076_v33 }
 0x7c5   :  { %v2882_v26 = vmul.f32 %v2878_v25, %v5080_v41  ;;  %v2883_v55 = vadd.f32 %v4093_v32, %v2881_v21 }
 0x7c7   :  { %v2884_v60 = vadd.f32 %v4094_v56, %v2882_v26  ;;  %2885 = vst [vmem:[%s5132_s11] sm:$0xff] %v2883_v55 }
 0x7c9   :  { %2886 = vst [vmem:[%s5132_s11 + $0x8] sm:$0xff] %v2884_v60 }

</bundles_post_ra>
